<compile_context>
chip_gen: v6e
topology: v6e:2x2x1
jax: 0.10.0
libtpu: 0.0.40
codegen_flags: <defaults>
</compile_context>

<pallas_src>
import jax
import jax.numpy as jnp
import numpy as np
from jax.experimental import pallas as pl
from jax.experimental.pallas import tpu as pltpu

HIGH = jax.lax.Precision.HIGHEST
COUT_PAD = 128          # lane-dense padded conv-output width (one full vreg)
MASK_VAL = -1e30        # folded into the bias rows of padded output columns


# ---------------------------------------------------------------------------
# Fused kernel: 3x3 conv (pre-composed with 1x1+BN) + grouped softmax
# ---------------------------------------------------------------------------
def _make_fused_kernel(tile_h, W, cin3, stride):
    M = tile_h * W

    def kernel(x_ref, w_ref, o_ref):
        # x_ref: (1, 1, tile_h+2, W, cin3) bf16 halo band, kj taps pre-packed
        # w_ref: (3, cin3, 128)            bf16 fused weights (+bias row,
        #                                  +softmax mask on padded columns)
        # o_ref: (1, tile_h, W, 128)       bf16 grouped-softmax probabilities
        band = x_ref[0, 0]                              # (tile_h+2, W, cin3)

        # 3 dots of K = cin3 = 3*(Cin+1); slicing only the untiled row axis.
        acc = jnp.zeros((M, COUT_PAD), jnp.float32)
        for ki in range(3):
            lhs = band[ki:ki + tile_h].reshape(M, cin3)
            acc = acc + jnp.dot(lhs, w_ref[ki],
                                preferred_element_type=jnp.float32)

        # Grouped softmax over channel residue classes (mod stride = r*r);
        # class max/sum via lane rolls (XLU) -> every lane ends up holding its
        # class statistic; fully lane-dense, no reshapes or partial stores.
        # Padded lanes carry ~-1e30 logits (mask folded into the weights) so
        # their exp underflows to exactly 0.
        m = acc
        sh = stride
        while sh < COUT_PAD:
            m = jnp.maximum(m, pltpu.roll(m, shift=sh, axis=1))
            sh *= 2
        e = jnp.exp(acc - m)
        s = e
        sh = stride
        while sh < COUT_PAD:
            s = s + pltpu.roll(s, shift=sh, axis=1)
            sh *= 2

        inv = pl.reciprocal(s, approx=True)             # EUP slot
        inv = inv * (2.0 - s * inv)                     # one Newton step
        o_ref[0] = (e * inv).reshape(tile_h, W, COUT_PAD).astype(o_ref.dtype)

    return kernel


def fused_carafe_head(x3u, w_ki, H, W, tile_h, stride):
    N, R, th2, Wx, cin3 = x3u.shape
    assert th2 == tile_h + 2 and Wx == W and H == R * tile_h

    kernel = _make_fused_kernel(tile_h, W, cin3, stride)
    flops = 2 * N * H * W * (3 * cin3) * COUT_PAD
    bytes_accessed = int(x3u.size) * x3u.dtype.itemsize \
        + int(w_ki.size) * w_ki.dtype.itemsize \
        + N * H * W * COUT_PAD * 2

    return pl.pallas_call(
        kernel,
        out_shape=jax.ShapeDtypeStruct((N, H, W, COUT_PAD), jnp.bfloat16),
        grid_spec=pltpu.PrefetchScalarGridSpec(
            num_scalar_prefetch=0,
            grid=(N, R),
            in_specs=[
                # per-row-tile halo band (halo-tiled fetch, bounded VMEM)
                pl.BlockSpec((1, 1, tile_h + 2, W, cin3),
                             lambda n, i: (n, i, 0, 0, 0)),
                # fused weights: tiny, resident across the whole grid
                pl.BlockSpec((3, cin3, COUT_PAD), lambda n, i: (0, 0, 0)),
            ],
            out_specs=pl.BlockSpec((1, tile_h, W, COUT_PAD),
                                   lambda n, i: (n, i, 0, 0))),
        compiler_params=pltpu.CompilerParams(
            dimension_semantics=("parallel", "parallel"),
            vmem_limit_bytes=32 * 1024 * 1024),
        cost_estimate=pl.CostEstimate(flops=flops,
                                      transcendentals=N * H * W * COUT_PAD,
                                      bytes_accessed=bytes_accessed),
    )(x3u, w_ki)


# ---------------------------------------------------------------------------
# Weight pre-composition (done once, outside the kernel, in f32)
# ---------------------------------------------------------------------------
def _prepare_fused_weights(params, cout):
    w1 = params["w1"].astype(jnp.float32)        # (Ccm, Cin, 1, 1) OIHW
    w2 = params["w2"].astype(jnp.float32)        # (Cout, Ccm, 3, 3) OIHW
    scale = params["bn_gamma"] * jax.lax.rsqrt(params["bn_var"] + params["bn_eps"])
    w_eff = w1[:, :, 0, 0].T * scale[None, :]                    # (Cin, Ccm)
    b_eff = params["bn_beta"] - params["bn_mean"] * scale        # (Ccm,)
    w2_t = jnp.transpose(w2, (2, 3, 1, 0)).reshape(9, w2.shape[1], cout)
    # Compose: (x @ w_eff + b_eff) @ w2[tap] == x @ wf[tap] + bf[tap]
    wf = jnp.einsum("ic,tco->tio", w_eff, w2_t, precision=HIGH)  # (9, Cin, Cout)
    bf = jnp.einsum("c,tco->to", b_eff, w2_t, precision=HIGH)    # (9, Cout)
    w_all = jnp.concatenate([wf, bf[:, None, :]], axis=1)        # (9, Cin+1, Cout)
    w_all = jnp.pad(w_all, ((0, 0), (0, 0), (0, COUT_PAD - cout)))
    # Fold the padded-lane softmax mask into the bias (ones-channel) row:
    # every in-image tap (>=4 per pixel) adds MASK_VAL to columns >= cout,
    # driving their logits to ~-1e31 -> exp underflows to exactly 0 in f32.
    lane_mask = (jnp.arange(COUT_PAD) >= cout).astype(jnp.float32) * MASK_VAL
    w_all = w_all.at[:, -1, :].add(lane_mask)
    cin_aug = w_all.shape[1]
    # Regroup (ki,kj,c) -> (ki, kj*cin_aug + c) to match the kj-packed input.
    w_ki = w_all.reshape(3, 3, cin_aug, COUT_PAD).reshape(3, 3 * cin_aug, COUT_PAD)
    return w_ki.astype(jnp.bfloat16)


def _pick_tile_h(H, W, max_m=2048):
    # Largest divisor of H whose (tile_h*W, 128) epilogue temporaries stay in
    # a comfortable VMEM budget; large tiles amortise per-grid-step overhead.
    # TODO(synk): also tile W for very wide feature maps.
    best = 1
    for d in range(1, H + 1):
        if H % d == 0 and d * W <= max_m:
            best = d
    return best


# ---------------------------------------------------------------------------
# Public forward (NCHW in / NCHW out, matching the PyTorch module)
# ---------------------------------------------------------------------------
def kernel_prediction_forward(x_nchw, params, out_dtype=jnp.bfloat16):
    r = int(params["enlarge_rate"])
    stride = r * r
    cout = params["w2"].shape[0]
    kup2 = cout // stride
    assert (cout <= COUT_PAD and COUT_PAD % stride == 0
            and ((COUT_PAD // stride) & (COUT_PAD // stride - 1)) == 0), \
        "roll-based grouped softmax needs 128/(enlarge_rate**2) to be a power of two"

    w_ki = _prepare_fused_weights(params, cout)      # (3, 3*(Cin+1), 128) bf16

    N, Cin, H, W = x_nchw.shape
    tile_h = _pick_tile_h(H, W)
    R = H // tile_h

    # --- XLA glue on the tiny <=27-channel tensor, all in bf16 ---------------
    x_nhwc = jnp.transpose(x_nchw.astype(jnp.bfloat16), (0, 2, 3, 1))
    ones = jnp.ones(x_nhwc.shape[:3] + (1,), jnp.bfloat16)   # carries folded BN bias
    x_aug = jnp.pad(jnp.concatenate([x_nhwc, ones], axis=-1),
                    ((0, 0), (1, 1), (1, 1), (0, 0)))        # (N, H+2, W+2, Cin+1)
    # pack the three kj taps into channels -> (N, H+2, W, 3*(Cin+1))
    x3 = jnp.concatenate([x_aug[:, :, kj:kj + W, :] for kj in range(3)], axis=-1)
    # halo-unfold into per-row-tile bands -> (N, R, tile_h+2, W, 3*(Cin+1))
    x3u = jnp.stack([x3[:, i * tile_h:i * tile_h + tile_h + 2] for i in range(R)],
                    axis=1)

    probs = fused_carafe_head(x3u, w_ki, H, W, tile_h, stride)  # (N,H,W,128) bf16

    # pixel_shuffle + NHWC->NCHW: pure-layout XLA pass on normalized probs.
    y = probs[..., :cout].reshape(N, H, W, kup2, r, r)   # (n,h,w,c,i,j)
    y = jnp.transpose(y, (0, 3, 1, 4, 2, 5))             # (n,c,h,i,w,j)
    return y.reshape(N, kup2, H * r, W * r).astype(out_dtype)


# ---------------------------------------------------------------------------
# Pure-JAX reference (NCHW, mimics the PyTorch forward) for verification
# ---------------------------------------------------------------------------
def reference_forward(x, params):
    y = jax.lax.conv_general_dilated(
        x, params["w1"], (1, 1), "VALID",
        dimension_numbers=("NCHW", "OIHW", "NCHW"), precision=HIGH)
    scale = params["bn_gamma"] / jnp.sqrt(params["bn_var"] + params["bn_eps"])
    y = ((y - params["bn_mean"][None, :, None, None])
         * scale[None, :, None, None]
         + params["bn_beta"][None, :, None, None])
    y = jax.lax.conv_general_dilated(
        y, params["w2"], (1, 1), "SAME",
        dimension_numbers=("NCHW", "OIHW", "NCHW"), precision=HIGH)
    r = params["enlarge_rate"]
    N, Cr2, H, W = y.shape
    C = Cr2 // (r * r)
    y = (y.reshape(N, C, r, r, H, W)
          .transpose(0, 1, 4, 2, 5, 3)
          .reshape(N, C, H * r, W * r))
    return jax.nn.softmax(y, axis=1)


if __name__ == "__main__":
    key = jax.random.PRNGKey(0)
    ks = jax.random.split(key, 7)

    N, Cin, H, W = 2, 8, 16, 16
    channel_cm, kernel_up, enlarge_rate = 64, 5, 2
    Cout = enlarge_rate * enlarge_rate * kernel_up * kernel_up   # 100

    x = jax.random.normal(ks[0], (N, Cin, H, W), jnp.float32)
    params = {
        "w1": 0.1 * jax.random.normal(ks[1], (channel_cm, Cin, 1, 1), jnp.float32),
        "bn_gamma": 1.0 + 0.1 * jax.random.normal(ks[2], (channel_cm,), jnp.float32),
        "bn_beta": 0.1 * jax.random.normal(ks[3], (channel_cm,), jnp.float32),
        "bn_mean": 0.1 * jax.random.normal(ks[4], (channel_cm,), jnp.float32),
        "bn_var": jnp.abs(jax.random.normal(ks[5], (channel_cm,), jnp.float32)) + 0.5,
        "bn_eps": 1e-5,
        "w2": 0.05 * jax.random.normal(ks[6], (Cout, channel_cm, 3, 3), jnp.float32),
        "enlarge_rate": enlarge_rate,
    }

    fwd = jax.jit(lambda v: kernel_prediction_forward(v, params))
    ref_fn = jax.jit(lambda v: reference_forward(v, params))

    out = jax.block_until_ready(fwd(x))
    ref = jax.block_until_ready(ref_fn(x))

    assert out.shape == (N, kernel_up * kernel_up,
                         H * enlarge_rate, W * enlarge_rate), out.shape
    # bf16 inputs / bf16 output -> compare with bf16-appropriate tolerance.
    np.testing.assert_allclose(np.asarray(out.astype(jnp.float32)),
                               np.asarray(ref), rtol=5e-2, atol=3e-4)
    print("KERNEL_OK")
</pallas_src>

<mosaic_0001>
module attributes {stable_mosaic.version = 11 : i64} {
  func.func @kernel(%arg0: i32, %arg1: i32, %arg2: memref<1x1x18x16x27xbf16, #tpu.memory_space<vmem>>, %arg3: memref<3x27x128xbf16, #tpu.memory_space<vmem>>, %arg4: memref<1x16x16x128xbf16, #tpu.memory_space<vmem>>) attributes {dimension_semantics = [#tpu.dimension_semantics<parallel>, #tpu.dimension_semantics<parallel>], iteration_bounds = array<i64: 2, 1>, scalar_prefetch = 0 : i64, scratch_operands = 0 : i64, tpu.core_type = #tpu.core_type<tc>, window_params = [{transform_indices = @transform_0, window_bounds = array<i64: 1, 1, 18, 16, 27>}, {pipeline_mode = #tpu.pipeline_mode<synchronous>, transform_indices = @transform_1, window_bounds = array<i64: 3, 27, 128>}, {transform_indices = @transform_2, window_bounds = array<i64: 1, 16, 16, 128>}]} {
    %c0 = arith.constant 0 : index
    %c0_0 = arith.constant 0 : index
    %c0_1 = arith.constant 0 : index
    %c0_2 = arith.constant 0 : index
    %c0_3 = arith.constant 0 : index
    %0 = vector.load %arg2[%c0, %c0_0, %c0_1, %c0_2, %c0_3] : memref<1x1x18x16x27xbf16, #tpu.memory_space<vmem>>, vector<1x1x18x16x27xbf16>
    %1 = vector.shape_cast %0 : vector<1x1x18x16x27xbf16> to vector<18x16x27xbf16>
    %cst = arith.constant 0.000000e+00 : f32
    %2 = vector.broadcast %cst : f32 to vector<256x128xf32>
    %3 = vector.extract_strided_slice %1 {offsets = [0, 0, 0], sizes = [16, 16, 27], strides = [1, 1, 1]} : vector<18x16x27xbf16> to vector<16x16x27xbf16>
    %4 = vector.shape_cast %3 : vector<16x16x27xbf16> to vector<256x27xbf16>
    %c0_4 = arith.constant 0 : index
    %c0_5 = arith.constant 0 : index
    %c0_6 = arith.constant 0 : index
    %5 = vector.load %arg3[%c0_4, %c0_5, %c0_6] : memref<3x27x128xbf16, #tpu.memory_space<vmem>>, vector<1x27x128xbf16>
    %6 = vector.shape_cast %5 : vector<1x27x128xbf16> to vector<27x128xbf16>
    %cst_7 = arith.constant dense<0.000000e+00> : vector<256x128xf32>
    %7 = tpu.matmul %4, %6, %cst_7 {dimension_numbers = #tpu.dot_dimension_numbers<[1], [0], [0], [1], [0, 0, 1, 1], [], []>} : vector<256x27xbf16>, vector<27x128xbf16>, vector<256x128xf32> -> vector<256x128xf32>
    %8 = arith.addf %2, %7 : vector<256x128xf32>
    %9 = vector.extract_strided_slice %1 {offsets = [1, 0, 0], sizes = [16, 16, 27], strides = [1, 1, 1]} : vector<18x16x27xbf16> to vector<16x16x27xbf16>
    %10 = vector.shape_cast %9 : vector<16x16x27xbf16> to vector<256x27xbf16>
    %c1 = arith.constant 1 : index
    %c0_8 = arith.constant 0 : index
    %c0_9 = arith.constant 0 : index
    %11 = vector.load %arg3[%c1, %c0_8, %c0_9] : memref<3x27x128xbf16, #tpu.memory_space<vmem>>, vector<1x27x128xbf16>
    %12 = vector.shape_cast %11 : vector<1x27x128xbf16> to vector<27x128xbf16>
    %cst_10 = arith.constant dense<0.000000e+00> : vector<256x128xf32>
    %13 = tpu.matmul %10, %12, %cst_10 {dimension_numbers = #tpu.dot_dimension_numbers<[1], [0], [0], [1], [0, 0, 1, 1], [], []>} : vector<256x27xbf16>, vector<27x128xbf16>, vector<256x128xf32> -> vector<256x128xf32>
    %14 = arith.addf %8, %13 : vector<256x128xf32>
    %15 = vector.extract_strided_slice %1 {offsets = [2, 0, 0], sizes = [16, 16, 27], strides = [1, 1, 1]} : vector<18x16x27xbf16> to vector<16x16x27xbf16>
    %16 = vector.shape_cast %15 : vector<16x16x27xbf16> to vector<256x27xbf16>
    %c2 = arith.constant 2 : index
    %c0_11 = arith.constant 0 : index
    %c0_12 = arith.constant 0 : index
    %17 = vector.load %arg3[%c2, %c0_11, %c0_12] : memref<3x27x128xbf16, #tpu.memory_space<vmem>>, vector<1x27x128xbf16>
    %18 = vector.shape_cast %17 : vector<1x27x128xbf16> to vector<27x128xbf16>
    %cst_13 = arith.constant dense<0.000000e+00> : vector<256x128xf32>
    %19 = tpu.matmul %16, %18, %cst_13 {dimension_numbers = #tpu.dot_dimension_numbers<[1], [0], [0], [1], [0, 0, 1, 1], [], []>} : vector<256x27xbf16>, vector<27x128xbf16>, vector<256x128xf32> -> vector<256x128xf32>
    %20 = arith.addf %14, %19 : vector<256x128xf32>
    %c4_i32 = arith.constant 4 : i32
    %21 = tpu.dynamic_rotate %20 by %c4_i32 dim 1 : vector<256x128xf32>, i32 -> vector<256x128xf32>
    %22 = arith.maximumf %20, %21 : vector<256x128xf32>
    %c8_i32 = arith.constant 8 : i32
    %23 = tpu.dynamic_rotate %22 by %c8_i32 dim 1 : vector<256x128xf32>, i32 -> vector<256x128xf32>
    %24 = arith.maximumf %22, %23 : vector<256x128xf32>
    %c16_i32 = arith.constant 16 : i32
    %25 = tpu.dynamic_rotate %24 by %c16_i32 dim 1 : vector<256x128xf32>, i32 -> vector<256x128xf32>
    %26 = arith.maximumf %24, %25 : vector<256x128xf32>
    %c32_i32 = arith.constant 32 : i32
    %27 = tpu.dynamic_rotate %26 by %c32_i32 dim 1 : vector<256x128xf32>, i32 -> vector<256x128xf32>
    %28 = arith.maximumf %26, %27 : vector<256x128xf32>
    %c64_i32 = arith.constant 64 : i32
    %29 = tpu.dynamic_rotate %28 by %c64_i32 dim 1 : vector<256x128xf32>, i32 -> vector<256x128xf32>
    %30 = arith.maximumf %28, %29 : vector<256x128xf32>
    %31 = arith.subf %20, %30 : vector<256x128xf32>
    %32 = math.exp %31 : vector<256x128xf32>
    %c4_i32_14 = arith.constant 4 : i32
    %33 = tpu.dynamic_rotate %32 by %c4_i32_14 dim 1 : vector<256x128xf32>, i32 -> vector<256x128xf32>
    %34 = arith.addf %32, %33 : vector<256x128xf32>
    %c8_i32_15 = arith.constant 8 : i32
    %35 = tpu.dynamic_rotate %34 by %c8_i32_15 dim 1 : vector<256x128xf32>, i32 -> vector<256x128xf32>
    %36 = arith.addf %34, %35 : vector<256x128xf32>
    %c16_i32_16 = arith.constant 16 : i32
    %37 = tpu.dynamic_rotate %36 by %c16_i32_16 dim 1 : vector<256x128xf32>, i32 -> vector<256x128xf32>
    %38 = arith.addf %36, %37 : vector<256x128xf32>
    %c32_i32_17 = arith.constant 32 : i32
    %39 = tpu.dynamic_rotate %38 by %c32_i32_17 dim 1 : vector<256x128xf32>, i32 -> vector<256x128xf32>
    %40 = arith.addf %38, %39 : vector<256x128xf32>
    %c64_i32_18 = arith.constant 64 : i32
    %41 = tpu.dynamic_rotate %40 by %c64_i32_18 dim 1 : vector<256x128xf32>, i32 -> vector<256x128xf32>
    %42 = arith.addf %40, %41 : vector<256x128xf32>
    %43 = tpu.reciprocal %42 {approx = true} : vector<256x128xf32> -> vector<256x128xf32>
    %44 = arith.mulf %42, %43 : vector<256x128xf32>
    %cst_19 = arith.constant 2.000000e+00 : f32
    %45 = vector.broadcast %cst_19 : f32 to vector<256x128xf32>
    %46 = arith.subf %45, %44 : vector<256x128xf32>
    %47 = arith.mulf %43, %46 : vector<256x128xf32>
    %48 = arith.mulf %32, %47 : vector<256x128xf32>
    %49 = vector.shape_cast %48 : vector<256x128xf32> to vector<16x16x128xf32>
    %50 = arith.truncf %49 : vector<16x16x128xf32> to vector<16x16x128xbf16>
    %c0_20 = arith.constant 0 : index
    %c0_21 = arith.constant 0 : index
    %c0_22 = arith.constant 0 : index
    %c0_23 = arith.constant 0 : index
    %51 = vector.load %arg4[%c0_20, %c0_21, %c0_22, %c0_23] : memref<1x16x16x128xbf16, #tpu.memory_space<vmem>>, vector<1x16x16x128xbf16>
    %52 = vector.shape_cast %51 : vector<1x16x16x128xbf16> to vector<16x16x128xbf16>
    %53 = vector.shape_cast %50 : vector<16x16x128xbf16> to vector<1x16x16x128xbf16>
    tpu.vector_store %arg4[%c0_20, %c0_21, %c0_22, %c0_23], %53 {strides = array<i32>} : memref<1x16x16x128xbf16, #tpu.memory_space<vmem>>, vector<1x16x16x128xbf16>,
    return
  }
  func.func @transform_0(%arg0: i32, %arg1: i32) -> (i32, i32, i32, i32, i32) {
    %c0_i32 = arith.constant 0 : i32
    %c0_i32_0 = arith.constant 0 : i32
    %c0_i32_1 = arith.constant 0 : i32
    %c0_i32_2 = arith.constant 0 : i32
    return %arg0, %arg1, %c0_i32, %c0_i32_0, %c0_i32_1 : i32, i32, i32, i32, i32
  }
  func.func @transform_1(%arg0: i32, %arg1: i32) -> (i32, i32, i32) {
    %c0_i32 = arith.constant 0 : i32
    %c0_i32_0 = arith.constant 0 : i32
    %c0_i32_1 = arith.constant 0 : i32
    %c0_i32_2 = arith.constant 0 : i32
    return %c0_i32, %c0_i32_0, %c0_i32_1 : i32, i32, i32
  }
  func.func @transform_2(%arg0: i32, %arg1: i32) -> (i32, i32, i32, i32) {
    %c0_i32 = arith.constant 0 : i32
    %c0_i32_0 = arith.constant 0 : i32
    %c0_i32_1 = arith.constant 0 : i32
    return %arg0, %arg1, %c0_i32, %c0_i32_0 : i32, i32, i32, i32
  }
}

</mosaic_0001>

<bundles_post_ra>
// kernel: _lambda_.1
= control target key start
LH: loop header
LB: loop body
LE: loop exit
PB: predicated region body
PF: predicated region fallthrough
CT: control target
= control target key end

     0   :  { %s3056_s9 = smov 0   ;;  %s3058_s10 = smov 0   ;;  %s5000_s0 = inlined_call_operand.vmem [shape: bf16[2,1,18,16,27], index: 0, kind: input, shape index: {}]   ;;  %s5001_s1 = inlined_call_operand.vmem [shape: bf16[3,27,128], index: 1, kind: input, shape index: {}]   ;;  %s5002_s2 = inlined_call_operand.vmem [shape: bf16[2,16,16,128], index: 2, kind: output, shape index: {}]  }
   0x1   :  { %s3060_s11 = smov 0  }
   0x2 LB: > { %s24_s12 = sadd.s32 1, %s3029_s10  ;;  %p2416_p0 = scmp.ge.s32.totalorder %s3033_s11, 1  ;;  %s3033_s11 = sphi %s3060_s11, %s12_s11   ;;  %s3029_s10 = sphi %s3058_s10, %s5094_s10   ;;  %s3025_s9 = sphi %s3056_s9, %s5093_s9  }
   0x3   : > { %p26_p1 = scmp.ge.s32.totalorder %s24_s12, 2  ;;  %p132_p2 = scmp.lt.s32.totalorder %s3033_s11, 3 }
   0x5   : > { %s5096_s12 = smov (%p26_p1, %s24_s12), 0  ;;  %p133_p3 = pnand %p2416_p0, %p132_p2 }
   0x7   : > { %136 = sbr.rel (%p133_p3) target bundleno = 1536 (0x600), region = 28 }
   0xc   : > { %v2859_v0 = vld [vmem:[%s5001_s1 + $0x18] sm:$0x3f]   ;;  %vm369_vm0 = vcmask 1044480   ;;  %vm370_vm1 = vcmask 1045504   ;;  %v3035_v1 = vmov 65535   ;;  %p163_p4 = scmp.lt.s32.totalorder %s3025_s9, 1 }
   0xd   : > { %v371_v2 = vsel %vm369_vm0, 4294967295, %v3035_v1  ;;  %v2860_v5 = vld [vmem:[%s5001_s1 + $0x10] sm:$0xff]   ;;  %v2865_v6 = vld [vmem:[%s5001_s1 + $0x8] sm:$0x3f]   ;;  %vm320_vm2 = vcmask 220160   ;;  %v2875_v13 = vld [vmem:[%s5001_s1] sm:$0xff]  }
   0xe   : > { %v372_v3 = vsel %vm370_vm1, %v371_v2, 0  ;;  %s5098_s9 = smov (!%p163_p4, %s3025_s9), 1  ;;  %v2866_v7 = vld [vmem:[%s5001_s1 + $0x28] sm:$0x3f]   ;;  %v2876_v14 = vld [vmem:[%s5001_s1 + $0x20] sm:$0xff]   ;;  %s3036_s29 = smov 4  }
   0xf   : > { %v374_v4 = vand.u32 %v2859_v0, %v372_v3  ;;  %s2828_s21 = smul.u32 144, %s5098_s9  ;;  %v557_v9 = vand.u32 %v2865_v6, %v372_v3  ;;  %v745_v10 = vand.u32 %v2866_v7, %v372_v3  ;;  %s3037_s30 = smov 8  }
  0x10   : > { %s3038_s3 = smov 16   ;;  %s3039_s4 = smov 32  }
  0x11   : > { %2716 = vmatprep.subr.bf16.mxu0 %v374_v4  ;;  %2824 = vmatprep.subr.bf16.mxu1 %v374_v4  ;;  %s3092_s24 = scalar_lea.vmem %s5000_s0, %s2828_s21  ;;  %s3040_s5 = smov 64  }
  0x12   : > { %2717 = vmatpush3.bf16.msra.mxu0 %v374_v4  ;;  %2826 = vmatpush3.bf16.msra.mxu1 %v374_v4  ;;  %v2861_v8 = vld [vmem:[%s3092_s24 + $0x8] sm:$0xff]   ;;  %v2863_v12 = vld [vmem:[%s3092_s24 + $0x10] sm:$0xff]   ;;  %v2867_v16 = vld [vmem:[%s3092_s24 + $0x18] sm:$0xff]   ;;  %s2534_s6 = sshll.u32 %s5098_s9, 7 }
  0x13   : > { %2718 = vmatprep.subr.bf16.mxu0 %v2860_v5  ;;  %2825 = vmatprep.subr.bf16.mxu1 %v2860_v5  ;;  %v2862_v11 = vld [vmem:[%s3092_s24 + $0x48] sm:$0xff]   ;;  %v2864_v15 = vld [vmem:[%s3092_s24 + $0x50] sm:$0xff]   ;;  %v2868_v17 = vld [vmem:[%s3092_s24 + $0x58] sm:$0xff]   ;;  %s4856_s9 = scalar_lea.vmem %s5002_s2, %s2534_s6 }
  0x14   : > { %2720 = vmatprep.mubr.msk.bf16.mxu0 %vm320_vm2, %v2861_v8  ;;  %2736 = vmatprep.mubr.msk.bf16.mxu1 %vm320_vm2, %v2862_v11  ;;  %v2869_v18 = vld [vmem:[%s3092_s24 + $0x20] sm:$0xff]   ;;  %v2871_v20 = vld [vmem:[%s3092_s24 + $0x28] sm:$0xff]   ;;  %v2873_v22 = vld [vmem:[%s3092_s24 + $0x30] sm:$0xff]  }
  0x15   : > { %v2870_v19 = vld [vmem:[%s3092_s24 + $0x60] sm:$0xff]   ;;  %v2872_v21 = vld [vmem:[%s3092_s24 + $0x68] sm:$0xff]   ;;  %v2874_v23 = vld [vmem:[%s3092_s24 + $0x70] sm:$0xff]  }
  0x16   : > { %2719 = vmatpush3.bf16.msra.mxu0 %v2860_v5  ;;  %2827 = vmatpush3.bf16.msra.mxu1 %v2860_v5  ;;  %v2877_v24 = vld [vmem:[%s3092_s24 + $0x38] sm:$0xff]   ;;  %v2879_v26 = vld [vmem:[%s3092_s24 + $0x40] sm:$0xff]   ;;  %v2882_v29 = vld [vmem:[%s3092_s24 + $0x88] sm:$0xff]  }
  0x17   : > { %2752 = vmatprep.subr.bf16.mxu1 %v557_v9  ;;  %2788 = vmatprep.subr.bf16.mxu0 %v745_v10  ;;  %v2878_v25 = vld [vmem:[%s3092_s24 + $0x78] sm:$0xff]   ;;  %v2880_v27 = vld [vmem:[%s3092_s24 + $0x80] sm:$0xff]  }
  0x18   : > { %v2881_v28 = vld [vmem:[%s3092_s24] sm:$0xff]  }
  0x19   : > { %2721 = vmatmul.mubr.msk.bf16.vlgmr.msra.gmra.mxu0 %vm320_vm2, %v2863_v12  ;;  %2737 = vmatmul.mubr.msk.bf16.vlgmr.msra.gmra.mxu1 %vm320_vm2, %v2864_v15 }
  0x1a   : > { %2753 = vmatpush3.bf16.msra.mxu1 %v557_v9  ;;  %2789 = vmatpush3.bf16.msra.mxu0 %v745_v10 }
  0x1b   : > { %2724 = vmatprep.mubr.msk.bf16.mxu0 %vm320_vm2, %v2867_v16  ;;  %2740 = vmatprep.mubr.msk.bf16.mxu1 %vm320_vm2, %v2868_v17 }
  0x1c   : > { %2754 = vmatprep.subr.bf16.mxu1 %v2875_v13  ;;  %2790 = vmatprep.subr.bf16.mxu0 %v2876_v14 }
  0x1e   : > { %2755 = vmatpush3.bf16.msra.mxu1 %v2875_v13  ;;  %2791 = vmatpush3.bf16.msra.mxu0 %v2876_v14 }
  0x21   : > { %2725 = vmatmul.mubr.msk.bf16.gmra.mxu0 %vm320_vm2, %v2869_v18  ;;  %2741 = vmatmul.mubr.msk.bf16.gmra.mxu1 %vm320_vm2, %v2870_v19 }
  0x22   : > { %2728 = vmatprep.mubr.msk.bf16.mxu0 %vm320_vm2, %v2871_v20  ;;  %2744 = vmatprep.mubr.msk.bf16.mxu1 %vm320_vm2, %v2872_v21 }
  0x29   : > { %2729 = vmatmul.mubr.msk.bf16.gmra.mxu0 %vm320_vm2, %v2873_v22  ;;  %2745 = vmatmul.mubr.msk.bf16.gmra.mxu1 %vm320_vm2, %v2874_v23 }
  0x2a   : > { %2732 = vmatprep.mubr.msk.bf16.mxu0 %vm320_vm2, %v2877_v24  ;;  %2748 = vmatprep.mubr.msk.bf16.mxu1 %vm320_vm2, %v2878_v25 }
  0x31   : > { %2733 = vmatmul.mubr.msk.bf16.gmra.mxu0 %vm320_vm2, %v2879_v26  ;;  %2749 = vmatmul.mubr.msk.bf16.gmra.mxu1 %vm320_vm2, %v2880_v27 }
  0x32   : > { %2756 = vmatprep.mubr.msk.bf16.mxu1 %vm320_vm2, %v2881_v28  ;;  %2792 = vmatprep.mubr.msk.bf16.mxu0 %vm320_vm2, %v2863_v12 }
  0x39   : > { %2757 = vmatmul.mubr.msk.bf16.vlgmr.msra.gmra.mxu1 %vm320_vm2, %v2861_v8  ;;  %2793 = vmatmul.mubr.msk.bf16.vlgmr.msra.gmra.mxu0 %vm320_vm2, %v2867_v16 }
  0x3a   : > { %2760 = vmatprep.mubr.msk.bf16.mxu1 %vm320_vm2, %v2863_v12  ;;  %2796 = vmatprep.mubr.msk.bf16.mxu0 %vm320_vm2, %v2869_v18 }
  0x41   : > { %2761 = vmatmul.mubr.msk.bf16.gmra.mxu1 %vm320_vm2, %v2867_v16  ;;  %2797 = vmatmul.mubr.msk.bf16.gmra.mxu0 %vm320_vm2, %v2871_v20 }
  0x42   : > { %2764 = vmatprep.mubr.msk.bf16.mxu1 %vm320_vm2, %v2869_v18  ;;  %2800 = vmatprep.mubr.msk.bf16.mxu0 %vm320_vm2, %v2873_v22 }
  0x49   : > { %2765 = vmatmul.mubr.msk.bf16.gmra.mxu1 %vm320_vm2, %v2871_v20  ;;  %2801 = vmatmul.mubr.msk.bf16.gmra.mxu0 %vm320_vm2, %v2877_v24 }
  0x4a   : > { %2768 = vmatprep.mubr.msk.bf16.mxu1 %vm320_vm2, %v2873_v22  ;;  %2804 = vmatprep.mubr.msk.bf16.mxu0 %vm320_vm2, %v2879_v26 }
  0x51   : > { %2769 = vmatmul.mubr.msk.bf16.gmra.mxu1 %vm320_vm2, %v2877_v24  ;;  %2805 = vmatmul.mubr.msk.bf16.gmra.mxu0 %vm320_vm2, %v2862_v11 }
  0x52   : > { %2772 = vmatprep.mubr.msk.bf16.mxu1 %vm320_vm2, %v2879_v26  ;;  %2808 = vmatprep.mubr.msk.bf16.mxu0 %vm320_vm2, %v2864_v15 }
  0x59   : > { %2773 = vmatmul.mubr.msk.bf16.gmra.mxu1 %vm320_vm2, %v2862_v11  ;;  %2809 = vmatmul.mubr.msk.bf16.gmra.mxu0 %vm320_vm2, %v2868_v17 }
  0x5a   : > { %2776 = vmatprep.mubr.msk.bf16.mxu1 %vm320_vm2, %v2864_v15  ;;  %2812 = vmatprep.mubr.msk.bf16.mxu0 %vm320_vm2, %v2870_v19 }
  0x61   : > { %2777 = vmatmul.mubr.msk.bf16.gmra.mxu1 %vm320_vm2, %v2868_v17  ;;  %2813 = vmatmul.mubr.msk.bf16.gmra.mxu0 %vm320_vm2, %v2872_v21 }
  0x62   : > { %2780 = vmatprep.mubr.msk.bf16.mxu1 %vm320_vm2, %v2870_v19  ;;  %2816 = vmatprep.mubr.msk.bf16.mxu0 %vm320_vm2, %v2874_v23 }
  0x69   : > { %2781 = vmatmul.mubr.msk.bf16.gmra.mxu1 %vm320_vm2, %v2872_v21  ;;  %2817 = vmatmul.mubr.msk.bf16.gmra.mxu0 %vm320_vm2, %v2878_v25 }
  0x6a   : > { %2784 = vmatprep.mubr.msk.bf16.mxu1 %vm320_vm2, %v2874_v23  ;;  %2820 = vmatprep.mubr.msk.bf16.mxu0 %vm320_vm2, %v2880_v27 }
  0x71   : > { %2785 = vmatmul.mubr.msk.bf16.gmra.mxu1 %vm320_vm2, %v2878_v25  ;;  %2821 = vmatmul.mubr.msk.bf16.gmra.mxu0 %vm320_vm2, %v2882_v29 }
  0xd9   : > { %v2722_v30 = vpop.f32.mrf.mxu0  ;;  %v3166_v31 = vpop.f32.mrf.mxu1 }
  0xdb   : > { %v410_v32 = vpop.f32.mrf.mxu0  ;;  %v3168_v33 = vpop.f32.mrf.mxu1 }
  0xdd   : > { %v2723_v34 = vpop.f32.mrf.mxu0  ;;  %v3170_v35 = vpop.f32.mrf.mxu1 }
  0xdf   : > { %v413_v36 = vpop.f32.mrf.mxu0  ;;  %v3172_v37 = vpop.f32.mrf.mxu1 }
  0xe1   : > { %v2726_v38 = vpop.f32.mrf.mxu0  ;;  %v3174_v39 = vpop.f32.mrf.mxu1 }
  0xe3   : > { %v426_v40 = vpop.f32.mrf.mxu0  ;;  %v3176_v41 = vpop.f32.mrf.mxu1 }
  0xe5   : > { %v2727_v42 = vpop.f32.mrf.mxu0  ;;  %v3178_v43 = vpop.f32.mrf.mxu1 }
  0xe7   : > { %v429_v44 = vpop.f32.mrf.mxu0  ;;  %v3180_v45 = vpop.f32.mrf.mxu1 }
  0xe9   : > { %v2730_v46 = vpop.f32.mrf.mxu0  ;;  %v3182_v47 = vpop.f32.mrf.mxu1 }
  0xeb   : > { %v442_v48 = vpop.f32.mrf.mxu0  ;;  %v3184_v49 = vpop.f32.mrf.mxu1 }
  0xed   : > { %v2731_v50 = vpop.f32.mrf.mxu0  ;;  %v3186_v51 = vpop.f32.mrf.mxu1 }
  0xef   : > { %v3188_v52 = vpop.f32.mrf.mxu0  ;;  %v3190_v53 = vpop.f32.mrf.mxu1 }
  0xf1   : > { %v3192_v54 = vpop.f32.mrf.mxu0  ;;  %v3194_v55 = vpop.f32.mrf.mxu1 }
  0xf3   : > { %v3196_v56 = vpop.f32.mrf.mxu0  ;;  %v3198_v57 = vpop.f32.mrf.mxu1 }
  0xf5   : > { %v3200_v58 = vpop.f32.mrf.mxu0  ;;  %v3202_v59 = vpop.f32.mrf.mxu1 }
  0xf7   : > { %v3204_v60 = vpop.f32.mrf.mxu0  ;;  %v3206_v61 = vpop.f32.mrf.mxu1 }
  0xf9   : > { %v2758_v62 = vpop.f32.mrf.mxu1  ;;  %v2794_v63 = vpop.f32.mrf.mxu0 }
  0xfa   : > { %v602_v0 = vadd.f32 %v2758_v62, %v2722_v30 }
  0xfb   : > { %v593_v1 = vpop.f32.mrf.mxu1  ;;  %v781_v2 = vpop.f32.mrf.mxu0 }
  0xfc   : > { %v3208_v3 = vadd.f32 %v2794_v63, %v602_v0  ;;  %v594_v4 = vadd.f32 %v593_v1, %v410_v32 }
  0xfd   : > { %v2759_v5 = vpop.f32.mrf.mxu1  ;;  %v2795_v6 = vpop.f32.mrf.mxu0 }
  0xfe   : > { %v3210_v7 = vadd.f32 %v781_v2, %v594_v4  ;;  %v605_v8 = vadd.f32 %v2759_v5, %v2723_v34  ;;  %944 = vrot.lane.b32.xlu1 %v3208_v3, %s3036_s29 }
  0xff   : > { %v596_v9 = vpop.f32.mrf.mxu1  ;;  %v784_v10 = vpop.f32.mrf.mxu0 }
 0x100   : > { %v3214_v11 = vadd.f32 %v2795_v6, %v605_v8  ;;  %v597_v12 = vadd.f32 %v596_v9, %v413_v36  ;;  %940 = vrot.lane.b32.xlu0 %v3210_v7, %s3036_s29 }
 0x101   : > { %v2762_v13 = vpop.f32.mrf.mxu1  ;;  %v2798_v14 = vpop.f32.mrf.mxu0 }
 0x102   : > { %v3218_v15 = vadd.f32 %v784_v10, %v597_v12  ;;  %v618_v16 = vadd.f32 %v2762_v13, %v2726_v38  ;;  %946 = vrot.lane.b32.xlu1 %v3214_v11, %s3036_s29 }
 0x103   : > { %v609_v17 = vpop.f32.mrf.mxu1  ;;  %v797_v18 = vpop.f32.mrf.mxu0 }
 0x104   : > { %942 = vrot.lane.b32.xlu0 %v3218_v15, %s3036_s29  ;;  %v3224_v21 = vadd.f32 %v2798_v14, %v618_v16  ;;  %v610_v22 = vadd.f32 %v609_v17, %v426_v40 }
 0x105   : > { %v2763_v19 = vpop.f32.mrf.mxu1  ;;  %v2799_v20 = vpop.f32.mrf.mxu0 }
 0x106   : > { %v621_v23 = vadd.f32 %v2763_v19, %v2727_v42  ;;  %v3230_v30 = vadd.f32 %v797_v18, %v610_v22 }
 0x107   : > { %v612_v24 = vpop.f32.mrf.mxu1  ;;  %v800_v25 = vpop.f32.mrf.mxu0 }
 0x108   : > { %v3226_v26 = vadd.f32 %v2799_v20, %v621_v23  ;;  %v613_v27 = vadd.f32 %v612_v24, %v429_v44  ;;  %952 = vrot.lane.b32.xlu0 %v3224_v21, %s3036_s29 }
 0x109   : > { %v2766_v28 = vpop.f32.mrf.mxu1  ;;  %v2802_v29 = vpop.f32.mrf.mxu0 }
 0x10a   : > { %v634_v32 = vadd.f32 %v2766_v28, %v2730_v46  ;;  %954 = vrot.lane.b32.xlu1 %v3226_v26, %s3036_s29  ;;  %v3234_v38 = vadd.f32 %v800_v25, %v613_v27 }
 0x10b   : > { %v625_v34 = vpop.f32.mrf.mxu1  ;;  %v813_v36 = vpop.f32.mrf.mxu0 }
 0x10c   : > { %948 = vrot.lane.b32.xlu0 %v3230_v30, %s3036_s29  ;;  %v3238_v44 = vadd.f32 %v2802_v29, %v634_v32  ;;  %v626_v62 = vadd.f32 %v625_v34, %v442_v48 }
 0x10d   : > { %v2767_v40 = vpop.f32.mrf.mxu1  ;;  %v2803_v42 = vpop.f32.mrf.mxu0 }
 0x10e   : > { %v637_v63 = vadd.f32 %v2767_v40, %v2731_v50  ;;  %950 = vrot.lane.b32.xlu1 %v3234_v38, %s3036_s29  ;;  %v3247_v6 = vadd.f32 %v813_v36, %v626_v62 }
 0x10f   : > { %v628_v46 = vpop.f32.mrf.mxu1  ;;  %v816_v0 = vpop.f32.mrf.mxu0 }
 0x110   : > { %v3242_v1 = vadd.f32 %v2803_v42, %v637_v63  ;;  %v629_v2 = vadd.f32 %v628_v46, %v3188_v52  ;;  %960 = vrot.lane.b32.xlu0 %v3238_v44, %s3036_s29 }
 0x111   : > { %v2770_v4 = vpop.f32.mrf.mxu1  ;;  %v2806_v5 = vpop.f32.mrf.mxu0 }
 0x112   : > { %v650_v8 = vadd.f32 %v2770_v4, %v3192_v54  ;;  %962 = vrot.lane.b32.xlu1 %v3242_v1, %s3036_s29  ;;  %v3252_v9 = vadd.f32 %v816_v0, %v629_v2 }
 0x113   : > { %v641_v48 = vpop.f32.mrf.mxu1  ;;  %v829_v50 = vpop.f32.mrf.mxu0 }
 0x114   : > { %956 = vrot.lane.b32.xlu0 %v3247_v6, %s3036_s29  ;;  %v3256_v12 = vadd.f32 %v2806_v5, %v650_v8  ;;  %v642_v13 = vadd.f32 %v641_v48, %v3196_v56 }
 0x115   : > { %v2771_v52 = vpop.f32.mrf.mxu1  ;;  %v2807_v10 = vpop.f32.mrf.mxu0 }
 0x116   : > { %v653_v14 = vadd.f32 %v2771_v52, %v3200_v58  ;;  %958 = vrot.lane.b32.xlu1 %v3252_v9, %s3036_s29  ;;  %v3267_v22 = vadd.f32 %v829_v50, %v642_v13 }
 0x117   : > { %v644_v54 = vpop.f32.mrf.mxu1  ;;  %v832_v16 = vpop.f32.mrf.mxu0 }
 0x118   : > { %v3262_v17 = vadd.f32 %v2807_v10, %v653_v14  ;;  %v645_v18 = vadd.f32 %v644_v54, %v3204_v60  ;;  %968 = vrot.lane.b32.xlu0 %v3256_v12, %s3036_s29 }
 0x119   : > { %v2774_v19 = vpop.f32.mrf.mxu1  ;;  %v2810_v20 = vpop.f32.mrf.mxu0 }
 0x11a   : > { %v666_v56 = vadd.f32 %v2774_v19, %v3166_v31  ;;  %970 = vrot.lane.b32.xlu1 %v3262_v17, %s3036_s29  ;;  %v3272_v24 = vadd.f32 %v832_v16, %v645_v18 }
 0x11b   : > { %v657_v58 = vpop.f32.mrf.mxu1  ;;  %v845_v23 = vpop.f32.mrf.mxu0 }
 0x11c   : > { %964 = vrot.lane.b32.xlu0 %v3267_v22, %s3036_s29  ;;  %v3276_v27 = vadd.f32 %v2810_v20, %v666_v56  ;;  %v658_v28 = vadd.f32 %v657_v58, %v3168_v33 }
 0x11d   : > { %v2775_v60 = vpop.f32.mrf.mxu1  ;;  %v2811_v25 = vpop.f32.mrf.mxu0 }
 0x11e   : > { %v669_v29 = vadd.f32 %v2775_v60, %v3170_v35  ;;  %966 = vrot.lane.b32.xlu1 %v3272_v24, %s3036_s29  ;;  %v3287_v62 = vadd.f32 %v845_v23, %v658_v28 }
 0x11f   : > { %v660_v31 = vpop.f32.mrf.mxu1  ;;  %v848_v32 = vpop.f32.mrf.mxu0 }
 0x120   : > { %v3282_v34 = vadd.f32 %v2811_v25, %v669_v29  ;;  %v661_v36 = vadd.f32 %v660_v31, %v3172_v37  ;;  %976 = vrot.lane.b32.xlu0 %v3276_v27, %s3036_s29 }
 0x121   : > { %v2778_v40 = vpop.f32.mrf.mxu1  ;;  %v2814_v42 = vpop.f32.mrf.mxu0 }
 0x122   : > { %v682_v33 = vadd.f32 %v2778_v40, %v3174_v39  ;;  %978 = vrot.lane.b32.xlu1 %v3282_v34, %s3036_s29  ;;  %v3292_v46 = vadd.f32 %v848_v32, %v661_v36 }
 0x123   : > { %v673_v35 = vpop.f32.mrf.mxu1  ;;  %v861_v63 = vpop.f32.mrf.mxu0 }
 0x124   : > { %972 = vrot.lane.b32.xlu0 %v3287_v62, %s3036_s29  ;;  %v3296_v2 = vadd.f32 %v2814_v42, %v682_v33  ;;  %v674_v4 = vadd.f32 %v673_v35, %v3176_v41 }
 0x125   : > { %v2779_v37 = vpop.f32.mrf.mxu1  ;;  %v2815_v0 = vpop.f32.mrf.mxu0 }
 0x126   : > { %v685_v5 = vadd.f32 %v2779_v37, %v3178_v43  ;;  %974 = vrot.lane.b32.xlu1 %v3292_v46, %s3036_s29  ;;  %v3307_v13 = vadd.f32 %v861_v63, %v674_v4 }
 0x127   : > { %v676_v39 = vpop.f32.mrf.mxu1  ;;  %v864_v8 = vpop.f32.mrf.mxu0 }
 0x128   : > { %v3302_v48 = vadd.f32 %v2815_v0, %v685_v5  ;;  %v677_v50 = vadd.f32 %v676_v39, %v3180_v45  ;;  %984 = vrot.lane.b32.xlu0 %v3296_v2, %s3036_s29 }
 0x129   : > { %v2782_v52 = vpop.f32.mrf.mxu1  ;;  %v2818_v10 = vpop.f32.mrf.mxu0 }
 0x12a   : > { %v698_v41 = vadd.f32 %v2782_v52, %v3182_v47  ;;  %986 = vrot.lane.b32.xlu1 %v3302_v48, %s3036_s29  ;;  %v3312_v54 = vadd.f32 %v864_v8, %v677_v50 }
 0x12b   : > { %v689_v43 = vpop.f32.mrf.mxu1  ;;  %v877_v14 = vpop.f32.mrf.mxu0 }
 0x12c   : > { %980 = vrot.lane.b32.xlu0 %v3307_v13, %s3036_s29  ;;  %v3316_v18 = vadd.f32 %v2818_v10, %v698_v41  ;;  %v690_v19 = vadd.f32 %v689_v43, %v3184_v49 }
 0x12d   : > { %v2783_v45 = vpop.f32.mrf.mxu1  ;;  %v2819_v16 = vpop.f32.mrf.mxu0 }
 0x12e   : > { %5033 = vst [vmem:[#allocation2_spill] sm:$0xff] %v3316_v18  ;;  %v701_v20 = vadd.f32 %v2783_v45, %v3186_v51  ;;  %982 = vrot.lane.b32.xlu1 %v3312_v54, %s3036_s29  ;;  %v3327_v28 = vadd.f32 %v877_v14, %v690_v19 }
 0x12f   : > { %v692_v47 = vpop.f32.mrf.mxu1  ;;  %v880_v56 = vpop.f32.mrf.mxu0 }
 0x130   : > { %v3322_v58 = vadd.f32 %v2819_v16, %v701_v20  ;;  %v693_v23 = vadd.f32 %v692_v47, %v3190_v53  ;;  %992 = vrot.lane.b32.xlu0 %v3316_v18, %s3036_s29  ;;  %5035 = vst [vmem:[#allocation4_spill] sm:$0xff] %v3327_v28 }
 0x131   : > { %v2786_v60 = vpop.f32.mrf.mxu1  ;;  %v2822_v25 = vpop.f32.mrf.mxu0 }
 0x132   : > { %5034 = vst [vmem:[#allocation3_spill] sm:$0xff] %v3322_v58  ;;  %v714_v49 = vadd.f32 %v2786_v60, %v3194_v55  ;;  %994 = vrot.lane.b32.xlu1 %v3322_v58, %s3036_s29  ;;  %v3332_v31 = vadd.f32 %v880_v56, %v693_v23 }
 0x133   : > { %v705_v51 = vpop.f32.mrf.mxu1  ;;  %v893_v29 = vpop.f32.mrf.mxu0 }
 0x134   : > { %5036 = vst [vmem:[#allocation5_spill] sm:$0xff] %v3332_v31  ;;  %988 = vrot.lane.b32.xlu0 %v3327_v28, %s3036_s29  ;;  %v3336_v32 = vadd.f32 %v2822_v25, %v714_v49  ;;  %v706_v36 = vadd.f32 %v705_v51, %v3198_v57 }
 0x135   : > { %v2787_v53 = vpop.f32.mrf.mxu1  ;;  %v2823_v55 = vpop.f32.mrf.mxu0 }
 0x136   : > { %5037 = vst [vmem:[#allocation6_spill] sm:$0xff] %v3336_v32  ;;  %v717_v40 = vadd.f32 %v2787_v53, %v3202_v59  ;;  %990 = vrot.lane.b32.xlu1 %v3332_v31, %s3036_s29  ;;  %v3347_v63 = vadd.f32 %v893_v29, %v706_v36 }
 0x137   : > { %v708_v42 = vpop.f32.mrf.mxu1  ;;  %v896_v57 = vpop.f32.mrf.mxu0 }
 0x138   : > { %v3342_v33 = vadd.f32 %v2823_v55, %v717_v40  ;;  %v709_v35 = vadd.f32 %v708_v42, %v3206_v61  ;;  %1000 = vrot.lane.b32.xlu0 %v3336_v32, %s3036_s29  ;;  %5039 = vst [vmem:[#allocation8_spill] sm:$0xff] %v3347_v63 }
 0x13a   : > { %5038 = vst [vmem:[#allocation7_spill] sm:$0xff] %v3342_v33  ;;  %1002 = vrot.lane.b32.xlu1 %v3342_v33, %s3036_s29  ;;  %v3351_v37 = vadd.f32 %v896_v57, %v709_v35 }
 0x13c   : > { %5040 = vst [vmem:[#allocation9_spill] sm:$0xff] %v3351_v37  ;;  %996 = vrot.lane.b32.xlu0 %v3347_v63, %s3036_s29 }
 0x13e   : > { %998 = vrot.lane.b32.xlu1 %v3351_v37, %s3036_s29 }
 0x170   : > { %v945_v59 = vpop.permute.xlu1 %944 }
 0x171   : > { %v3358_v61 = vmax.f32 %v3208_v3, %v945_v59 }
 0x172   : > { %v941_v0 = vpop.permute.xlu0 %940 }
 0x173   : > { %1040 = vrot.lane.b32.xlu0 %v3358_v61, %s3037_s30  ;;  %v3363_v5 = vmax.f32 %v3210_v7, %v941_v0 }
 0x174   : > { %v947_v4 = vpop.permute.xlu1 %946 }
 0x175   : > { %v3366_v39 = vmax.f32 %v3214_v11, %v947_v4 }
 0x176   : > { %v943_v8 = vpop.permute.xlu0 %942 }
 0x177   : > { %1042 = vrot.lane.b32.xlu1 %v3366_v39, %s3037_s30  ;;  %1036 = vrot.lane.b32.xlu0 %v3363_v5, %s3037_s30  ;;  %v3373_v50 = vmax.f32 %v3218_v15, %v943_v8 }
 0x17a   : > { %v953_v52 = vpop.permute.xlu0 %952 }
 0x17b   : > { %v3376_v10 = vmax.f32 %v3224_v21, %v953_v52  ;;  %1038 = vrot.lane.b32.xlu1 %v3373_v50, %s3037_s30 }
 0x17c   : > { %v955_v41 = vpop.permute.xlu1 %954 }
 0x17d   : > { %v3381_v43 = vmax.f32 %v3226_v26, %v955_v41  ;;  %1048 = vrot.lane.b32.xlu0 %v3376_v10, %s3037_s30 }
 0x17e   : > { %v949_v14 = vpop.permute.xlu0 %948 }
 0x17f   : > { %v3386_v45 = vmax.f32 %v3230_v30, %v949_v14  ;;  %1050 = vrot.lane.b32.xlu1 %v3381_v43, %s3037_s30 }
 0x180   : > { %v951_v16 = vpop.permute.xlu1 %950 }
 0x181   : > { %v3391_v19 = vmax.f32 %v3234_v38, %v951_v16  ;;  %1044 = vrot.lane.b32.xlu0 %v3386_v45, %s3037_s30 }
 0x182   : > { %v961_v20 = vpop.permute.xlu0 %960 }
 0x183   : > { %v3396_v47 = vmax.f32 %v3238_v44, %v961_v20  ;;  %1046 = vrot.lane.b32.xlu1 %v3391_v19, %s3037_s30 }
 0x184   : > { %v963_v56 = vpop.permute.xlu1 %962 }
 0x185   : > { %v3401_v23 = vmax.f32 %v3242_v1, %v963_v56  ;;  %1056 = vrot.lane.b32.xlu0 %v3396_v47, %s3037_s30 }
 0x186   : > { %v957_v60 = vpop.permute.xlu0 %956 }
 0x187   : > { %v3406_v25 = vmax.f32 %v3247_v6, %v957_v60  ;;  %1058 = vrot.lane.b32.xlu1 %v3401_v23, %s3037_s30 }
 0x188   : > { %v959_v49 = vpop.permute.xlu1 %958 }
 0x189   : > { %v3411_v51 = vmax.f32 %v3252_v9, %v959_v49  ;;  %1052 = vrot.lane.b32.xlu0 %v3406_v25, %s3037_s30 }
 0x18a   : > { %v969_v29 = vpop.permute.xlu0 %968 }
 0x18b   : > { %v3416_v53 = vmax.f32 %v3256_v12, %v969_v29  ;;  %1054 = vrot.lane.b32.xlu1 %v3411_v51, %s3037_s30 }
 0x18c   : > { %v971_v36 = vpop.permute.xlu1 %970 }
 0x18d   : > { %v3421_v40 = vmax.f32 %v3262_v17, %v971_v36  ;;  %1064 = vrot.lane.b32.xlu0 %v3416_v53, %s3037_s30 }
 0x18e   : > { %v965_v55 = vpop.permute.xlu0 %964 }
 0x18f   : > { %v3426_v42 = vmax.f32 %v3267_v22, %v965_v55  ;;  %1066 = vrot.lane.b32.xlu1 %v3421_v40, %s3037_s30 }
 0x190   : > { %v967_v35 = vpop.permute.xlu1 %966 }
 0x191   : > { %v3431_v57 = vmax.f32 %v3272_v24, %v967_v35  ;;  %1060 = vrot.lane.b32.xlu0 %v3426_v42, %s3037_s30 }
 0x192   : > { %v977_v59 = vpop.permute.xlu0 %976 }
 0x193   : > { %v3436_v0 = vmax.f32 %v3276_v27, %v977_v59  ;;  %1062 = vrot.lane.b32.xlu1 %v3431_v57, %s3037_s30 }
 0x194   : > { %v979_v4 = vpop.permute.xlu1 %978 }
 0x195   : > { %v3441_v8 = vmax.f32 %v3282_v34, %v979_v4  ;;  %1072 = vrot.lane.b32.xlu0 %v3436_v0, %s3037_s30 }
 0x196   : > { %v973_v52 = vpop.permute.xlu0 %972 }
 0x197   : > { %v3446_v41 = vmax.f32 %v3287_v62, %v973_v52  ;;  %1074 = vrot.lane.b32.xlu1 %v3441_v8, %s3037_s30 }
 0x198   : > { %v975_v14 = vpop.permute.xlu1 %974 }
 0x199   : > { %v3451_v16 = vmax.f32 %v3292_v46, %v975_v14  ;;  %1068 = vrot.lane.b32.xlu0 %v3446_v41, %s3037_s30 }
 0x19a   : > { %v985_v20 = vpop.permute.xlu0 %984 }
 0x19b   : > { %v3456_v56 = vmax.f32 %v3296_v2, %v985_v20  ;;  %1070 = vrot.lane.b32.xlu1 %v3451_v16, %s3037_s30 }
 0x19c   : > { %v987_v60 = vpop.permute.xlu1 %986 }
 0x19d   : > { %v3461_v49 = vmax.f32 %v3302_v48, %v987_v60  ;;  %1080 = vrot.lane.b32.xlu0 %v3456_v56, %s3037_s30 }
 0x19e   : > { %v981_v29 = vpop.permute.xlu0 %980 }
 0x19f   : > { %v3466_v36 = vmax.f32 %v3307_v13, %v981_v29  ;;  %1082 = vrot.lane.b32.xlu1 %v3461_v49, %s3037_s30 }
 0x1a0   : > { %v983_v55 = vpop.permute.xlu1 %982 }
 0x1a1   : > { %v3471_v35 = vmax.f32 %v3312_v54, %v983_v55  ;;  %1076 = vrot.lane.b32.xlu0 %v3466_v36, %s3037_s30 }
 0x1a2   : > { %v993_v59 = vpop.permute.xlu0 %992 }
 0x1a3   : > { %v3476_v4 = vmax.f32 %v3316_v18, %v993_v59  ;;  %1078 = vrot.lane.b32.xlu1 %v3471_v35, %s3037_s30 }
 0x1a4   : > { %v995_v52 = vpop.permute.xlu1 %994 }
 0x1a5   : > { %v3481_v14 = vmax.f32 %v3322_v58, %v995_v52  ;;  %1088 = vrot.lane.b32.xlu0 %v3476_v4, %s3037_s30 }
 0x1a6   : > { %v989_v20 = vpop.permute.xlu0 %988 }
 0x1a7   : > { %v3486_v60 = vmax.f32 %v3327_v28, %v989_v20  ;;  %1090 = vrot.lane.b32.xlu1 %v3481_v14, %s3037_s30 }
 0x1a8   : > { %v991_v29 = vpop.permute.xlu1 %990 }
 0x1a9   : > { %v3491_v55 = vmax.f32 %v3332_v31, %v991_v29  ;;  %1084 = vrot.lane.b32.xlu0 %v3486_v60, %s3037_s30 }
 0x1aa   : > { %v1001_v59 = vpop.permute.xlu0 %1000 }
 0x1ab   : > { %v3496_v52 = vmax.f32 %v3336_v32, %v1001_v59  ;;  %1086 = vrot.lane.b32.xlu1 %v3491_v55, %s3037_s30 }
 0x1ac   : > { %v1003_v58 = vpop.permute.xlu1 %1002 }
 0x1ad   : > { %v3501_v20 = vmax.f32 %v3342_v33, %v1003_v58  ;;  %1096 = vrot.lane.b32.xlu0 %v3496_v52, %s3037_s30 }
 0x1ae   : > { %v997_v28 = vpop.permute.xlu0 %996 }
 0x1af   : > { %v3506_v29 = vmax.f32 %v3347_v63, %v997_v28  ;;  %1098 = vrot.lane.b32.xlu1 %v3501_v20, %s3037_s30 }
 0x1b0   : > { %v999_v31 = vpop.permute.xlu1 %998 }
 0x1b1   : > { %v3511_v59 = vmax.f32 %v3351_v37, %v999_v31  ;;  %1092 = vrot.lane.b32.xlu0 %v3506_v29, %s3037_s30 }
 0x1b3   : > { %1094 = vrot.lane.b32.xlu1 %v3511_v59, %s3037_s30 }
 0x1e5   : > { %v1041_v58 = vpop.permute.xlu0 %1040 }
 0x1e6   : > { %v3518_v33 = vmax.f32 %v3358_v61, %v1041_v58 }
 0x1e8   : > { %1136 = vrot.lane.b32.xlu0 %v3518_v33, %s3038_s3 }
 0x1e9   : > { %v1043_v28 = vpop.permute.xlu1 %1042  ;;  %v1037_v63 = vpop.permute.xlu0 %1036 }
 0x1ea   : > { %v3523_v32 = vmax.f32 %v3366_v39, %v1043_v28  ;;  %v3526_v31 = vmax.f32 %v3363_v5, %v1037_v63 }
 0x1ec   : > { %1138 = vrot.lane.b32.xlu1 %v3523_v32, %s3038_s3  ;;  %1132 = vrot.lane.b32.xlu0 %v3526_v31, %s3038_s3 }
 0x1ed   : > { %v1039_v61 = vpop.permute.xlu1 %1038 }
 0x1ee   : > { %v3533_v58 = vmax.f32 %v3373_v50, %v1039_v61 }
 0x1ef   : > { %v1049_v37 = vpop.permute.xlu0 %1048 }
 0x1f0   : > { %v3536_v18 = vmax.f32 %v3376_v10, %v1049_v37  ;;  %1134 = vrot.lane.b32.xlu1 %v3533_v58, %s3038_s3 }
 0x1f1   : > { %v1051_v39 = vpop.permute.xlu1 %1050 }
 0x1f2   : > { %v3541_v63 = vmax.f32 %v3381_v43, %v1051_v39  ;;  %1144 = vrot.lane.b32.xlu0 %v3536_v18, %s3038_s3 }
 0x1f3   : > { %v1045_v5 = vpop.permute.xlu0 %1044 }
 0x1f4   : > { %v3546_v28 = vmax.f32 %v3386_v45, %v1045_v5  ;;  %1146 = vrot.lane.b32.xlu1 %v3541_v63, %s3038_s3 }
 0x1f5   : > { %v1047_v50 = vpop.permute.xlu1 %1046 }
 0x1f6   : > { %v3551_v37 = vmax.f32 %v3391_v19, %v1047_v50  ;;  %1140 = vrot.lane.b32.xlu0 %v3546_v28, %s3038_s3 }
 0x1f7   : > { %v1057_v10 = vpop.permute.xlu0 %1056 }
 0x1f8   : > { %v3556_v43 = vmax.f32 %v3396_v47, %v1057_v10  ;;  %1142 = vrot.lane.b32.xlu1 %v3551_v37, %s3038_s3 }
 0x1f9   : > { %v1059_v61 = vpop.permute.xlu1 %1058 }
 0x1fa   : > { %v3561_v45 = vmax.f32 %v3401_v23, %v1059_v61  ;;  %1152 = vrot.lane.b32.xlu0 %v3556_v43, %s3038_s3 }
 0x1fb   : > { %v1053_v39 = vpop.permute.xlu0 %1052 }
 0x1fc   : > { %v3566_v19 = vmax.f32 %v3406_v25, %v1053_v39  ;;  %1154 = vrot.lane.b32.xlu1 %v3561_v45, %s3038_s3 }
 0x1fd   : > { %v1055_v5 = vpop.permute.xlu1 %1054 }
 0x1fe   : > { %v3571_v47 = vmax.f32 %v3411_v51, %v1055_v5  ;;  %1148 = vrot.lane.b32.xlu0 %v3566_v19, %s3038_s3 }
 0x1ff   : > { %v1065_v50 = vpop.permute.xlu0 %1064 }
 0x200   : > { %v3576_v23 = vmax.f32 %v3416_v53, %v1065_v50  ;;  %1150 = vrot.lane.b32.xlu1 %v3571_v47, %s3038_s3 }
 0x201   : > { %v1067_v10 = vpop.permute.xlu1 %1066 }
 0x202   : > { %v3581_v25 = vmax.f32 %v3421_v40, %v1067_v10  ;;  %1160 = vrot.lane.b32.xlu0 %v3576_v23, %s3038_s3 }
 0x203   : > { %v1061_v61 = vpop.permute.xlu0 %1060 }
 0x204   : > { %v3586_v51 = vmax.f32 %v3426_v42, %v1061_v61  ;;  %1162 = vrot.lane.b32.xlu1 %v3581_v25, %s3038_s3 }
 0x205   : > { %v1063_v39 = vpop.permute.xlu1 %1062 }
 0x206   : > { %v3591_v53 = vmax.f32 %v3431_v57, %v1063_v39  ;;  %1156 = vrot.lane.b32.xlu0 %v3586_v51, %s3038_s3 }
 0x207   : > { %v1073_v5 = vpop.permute.xlu0 %1072 }
 0x208   : > { %v3596_v40 = vmax.f32 %v3436_v0, %v1073_v5  ;;  %1158 = vrot.lane.b32.xlu1 %v3591_v53, %s3038_s3 }
 0x209   : > { %v1075_v50 = vpop.permute.xlu1 %1074 }
 0x20a   : > { %v3601_v42 = vmax.f32 %v3441_v8, %v1075_v50  ;;  %1168 = vrot.lane.b32.xlu0 %v3596_v40, %s3038_s3 }
 0x20b   : > { %v1069_v10 = vpop.permute.xlu0 %1068 }
 0x20c   : > { %v3606_v57 = vmax.f32 %v3446_v41, %v1069_v10  ;;  %1170 = vrot.lane.b32.xlu1 %v3601_v42, %s3038_s3 }
 0x20d   : > { %v1071_v61 = vpop.permute.xlu1 %1070 }
 0x20e   : > { %v3611_v0 = vmax.f32 %v3451_v16, %v1071_v61  ;;  %1164 = vrot.lane.b32.xlu0 %v3606_v57, %s3038_s3 }
 0x20f   : > { %v1081_v39 = vpop.permute.xlu0 %1080 }
 0x210   : > { %v3616_v8 = vmax.f32 %v3456_v56, %v1081_v39  ;;  %1166 = vrot.lane.b32.xlu1 %v3611_v0, %s3038_s3 }
 0x211   : > { %v1083_v5 = vpop.permute.xlu1 %1082 }
 0x212   : > { %v3621_v41 = vmax.f32 %v3461_v49, %v1083_v5  ;;  %1176 = vrot.lane.b32.xlu0 %v3616_v8, %s3038_s3 }
 0x213   : > { %v1077_v50 = vpop.permute.xlu0 %1076 }
 0x214   : > { %v3626_v16 = vmax.f32 %v3466_v36, %v1077_v50  ;;  %1178 = vrot.lane.b32.xlu1 %v3621_v41, %s3038_s3 }
 0x215   : > { %v1079_v10 = vpop.permute.xlu1 %1078 }
 0x216   : > { %v3631_v56 = vmax.f32 %v3471_v35, %v1079_v10  ;;  %1172 = vrot.lane.b32.xlu0 %v3626_v16, %s3038_s3 }
 0x217   : > { %v1089_v61 = vpop.permute.xlu0 %1088 }
 0x218   : > { %v3636_v49 = vmax.f32 %v3476_v4, %v1089_v61  ;;  %1174 = vrot.lane.b32.xlu1 %v3631_v56, %s3038_s3 }
 0x219   : > { %v1091_v39 = vpop.permute.xlu1 %1090 }
 0x21a   : > { %v3641_v36 = vmax.f32 %v3481_v14, %v1091_v39  ;;  %1184 = vrot.lane.b32.xlu0 %v3636_v49, %s3038_s3 }
 0x21b   : > { %v1085_v5 = vpop.permute.xlu0 %1084 }
 0x21c   : > { %v3646_v35 = vmax.f32 %v3486_v60, %v1085_v5  ;;  %1186 = vrot.lane.b32.xlu1 %v3641_v36, %s3038_s3 }
 0x21d   : > { %v1087_v50 = vpop.permute.xlu1 %1086 }
 0x21e   : > { %v3651_v4 = vmax.f32 %v3491_v55, %v1087_v50  ;;  %1180 = vrot.lane.b32.xlu0 %v3646_v35, %s3038_s3 }
 0x21f   : > { %v1097_v10 = vpop.permute.xlu0 %1096 }
 0x220   : > { %v3656_v14 = vmax.f32 %v3496_v52, %v1097_v10  ;;  %1182 = vrot.lane.b32.xlu1 %v3651_v4, %s3038_s3 }
 0x221   : > { %v1099_v61 = vpop.permute.xlu1 %1098 }
 0x222   : > { %v3661_v60 = vmax.f32 %v3501_v20, %v1099_v61  ;;  %1192 = vrot.lane.b32.xlu0 %v3656_v14, %s3038_s3 }
 0x223   : > { %v1093_v39 = vpop.permute.xlu0 %1092 }
 0x224   : > { %v3666_v55 = vmax.f32 %v3506_v29, %v1093_v39  ;;  %1194 = vrot.lane.b32.xlu1 %v3661_v60, %s3038_s3 }
 0x225   : > { %v1095_v5 = vpop.permute.xlu1 %1094 }
 0x226   : > { %v3671_v52 = vmax.f32 %v3511_v59, %v1095_v5  ;;  %1188 = vrot.lane.b32.xlu0 %v3666_v55, %s3038_s3 }
 0x228   : > { %1190 = vrot.lane.b32.xlu1 %v3671_v52, %s3038_s3 }
 0x25a   : > { %v1137_v20 = vpop.permute.xlu0 %1136 }
 0x25b   : > { %v3678_v50 = vmax.f32 %v3518_v33, %v1137_v20 }
 0x25d   : > { %1232 = vrot.lane.b32.xlu0 %v3678_v50, %s3039_s4 }
 0x25e   : > { %v1139_v29 = vpop.permute.xlu1 %1138  ;;  %v1133_v10 = vpop.permute.xlu0 %1132 }
 0x25f   : > { %v3683_v61 = vmax.f32 %v3523_v32, %v1139_v29  ;;  %v3686_v59 = vmax.f32 %v3526_v31, %v1133_v10 }
 0x261   : > { %1234 = vrot.lane.b32.xlu1 %v3683_v61, %s3039_s4  ;;  %1228 = vrot.lane.b32.xlu0 %v3686_v59, %s3039_s4 }
 0x262   : > { %v1135_v33 = vpop.permute.xlu1 %1134 }
 0x263   : > { %v3693_v39 = vmax.f32 %v3533_v58, %v1135_v33 }
 0x264   : > { %v1145_v5 = vpop.permute.xlu0 %1144 }
 0x265   : > { %v3696_v20 = vmax.f32 %v3536_v18, %v1145_v5  ;;  %1230 = vrot.lane.b32.xlu1 %v3693_v39, %s3039_s4 }
 0x266   : > { %v1147_v32 = vpop.permute.xlu1 %1146 }
 0x267   : > { %v3701_v31 = vmax.f32 %v3541_v63, %v1147_v32  ;;  %1240 = vrot.lane.b32.xlu0 %v3696_v20, %s3039_s4 }
 0x268   : > { %v1141_v29 = vpop.permute.xlu0 %1140 }
 0x269   : > { %v3706_v10 = vmax.f32 %v3546_v28, %v1141_v29  ;;  %1242 = vrot.lane.b32.xlu1 %v3701_v31, %s3039_s4 }
 0x26a   : > { %v1143_v58 = vpop.permute.xlu1 %1142 }
 0x26b   : > { %v3711_v18 = vmax.f32 %v3551_v37, %v1143_v58  ;;  %1236 = vrot.lane.b32.xlu0 %v3706_v10, %s3039_s4 }
 0x26c   : > { %v1153_v33 = vpop.permute.xlu0 %1152 }
 0x26d   : > { %v3716_v63 = vmax.f32 %v3556_v43, %v1153_v33  ;;  %1238 = vrot.lane.b32.xlu1 %v3711_v18, %s3039_s4 }
 0x26e   : > { %v1155_v5 = vpop.permute.xlu1 %1154 }
 0x26f   : > { %v3721_v28 = vmax.f32 %v3561_v45, %v1155_v5  ;;  %1248 = vrot.lane.b32.xlu0 %v3716_v63, %s3039_s4 }
 0x270   : > { %v1149_v32 = vpop.permute.xlu0 %1148 }
 0x271   : > { %v3726_v37 = vmax.f32 %v3566_v19, %v1149_v32  ;;  %1250 = vrot.lane.b32.xlu1 %v3721_v28, %s3039_s4 }
 0x272   : > { %v1151_v29 = vpop.permute.xlu1 %1150 }
 0x273   : > { %v3731_v43 = vmax.f32 %v3571_v47, %v1151_v29  ;;  %1244 = vrot.lane.b32.xlu0 %v3726_v37, %s3039_s4 }
 0x274   : > { %v1161_v58 = vpop.permute.xlu0 %1160 }
 0x275   : > { %v3736_v45 = vmax.f32 %v3576_v23, %v1161_v58  ;;  %1246 = vrot.lane.b32.xlu1 %v3731_v43, %s3039_s4 }
 0x276   : > { %v1163_v33 = vpop.permute.xlu1 %1162 }
 0x277   : > { %v3741_v19 = vmax.f32 %v3581_v25, %v1163_v33  ;;  %1256 = vrot.lane.b32.xlu0 %v3736_v45, %s3039_s4 }
 0x278   : > { %v1157_v5 = vpop.permute.xlu0 %1156 }
 0x279   : > { %v3746_v47 = vmax.f32 %v3586_v51, %v1157_v5  ;;  %1258 = vrot.lane.b32.xlu1 %v3741_v19, %s3039_s4 }
 0x27a   : > { %v1159_v32 = vpop.permute.xlu1 %1158 }
 0x27b   : > { %v3751_v23 = vmax.f32 %v3591_v53, %v1159_v32  ;;  %1252 = vrot.lane.b32.xlu0 %v3746_v47, %s3039_s4 }
 0x27c   : > { %v1169_v29 = vpop.permute.xlu0 %1168 }
 0x27d   : > { %v3756_v25 = vmax.f32 %v3596_v40, %v1169_v29  ;;  %1254 = vrot.lane.b32.xlu1 %v3751_v23, %s3039_s4 }
 0x27e   : > { %v1171_v58 = vpop.permute.xlu1 %1170 }
 0x27f   : > { %v3761_v51 = vmax.f32 %v3601_v42, %v1171_v58  ;;  %1264 = vrot.lane.b32.xlu0 %v3756_v25, %s3039_s4 }
 0x280   : > { %v1165_v33 = vpop.permute.xlu0 %1164 }
 0x281   : > { %v3766_v53 = vmax.f32 %v3606_v57, %v1165_v33  ;;  %1266 = vrot.lane.b32.xlu1 %v3761_v51, %s3039_s4 }
 0x282   : > { %v1167_v5 = vpop.permute.xlu1 %1166 }
 0x283   : > { %v3771_v40 = vmax.f32 %v3611_v0, %v1167_v5  ;;  %1260 = vrot.lane.b32.xlu0 %v3766_v53, %s3039_s4 }
 0x284   : > { %v1177_v32 = vpop.permute.xlu0 %1176 }
 0x285   : > { %v3776_v42 = vmax.f32 %v3616_v8, %v1177_v32  ;;  %1262 = vrot.lane.b32.xlu1 %v3771_v40, %s3039_s4 }
 0x286   : > { %v1179_v29 = vpop.permute.xlu1 %1178 }
 0x287   : > { %v3781_v57 = vmax.f32 %v3621_v41, %v1179_v29  ;;  %1272 = vrot.lane.b32.xlu0 %v3776_v42, %s3039_s4 }
 0x288   : > { %v1173_v58 = vpop.permute.xlu0 %1172 }
 0x289   : > { %v3786_v0 = vmax.f32 %v3626_v16, %v1173_v58  ;;  %1274 = vrot.lane.b32.xlu1 %v3781_v57, %s3039_s4 }
 0x28a   : > { %v1175_v33 = vpop.permute.xlu1 %1174 }
 0x28b   : > { %v3791_v8 = vmax.f32 %v3631_v56, %v1175_v33  ;;  %1268 = vrot.lane.b32.xlu0 %v3786_v0, %s3039_s4 }
 0x28c   : > { %v1185_v5 = vpop.permute.xlu0 %1184 }
 0x28d   : > { %v3796_v41 = vmax.f32 %v3636_v49, %v1185_v5  ;;  %1270 = vrot.lane.b32.xlu1 %v3791_v8, %s3039_s4 }
 0x28e   : > { %v1187_v32 = vpop.permute.xlu1 %1186 }
 0x28f   : > { %v3801_v16 = vmax.f32 %v3641_v36, %v1187_v32  ;;  %1280 = vrot.lane.b32.xlu0 %v3796_v41, %s3039_s4 }
 0x290   : > { %v1181_v29 = vpop.permute.xlu0 %1180 }
 0x291   : > { %v3806_v56 = vmax.f32 %v3646_v35, %v1181_v29  ;;  %1282 = vrot.lane.b32.xlu1 %v3801_v16, %s3039_s4 }
 0x292   : > { %v1183_v58 = vpop.permute.xlu1 %1182 }
 0x293   : > { %v3811_v49 = vmax.f32 %v3651_v4, %v1183_v58  ;;  %1276 = vrot.lane.b32.xlu0 %v3806_v56, %s3039_s4 }
 0x294   : > { %v1193_v33 = vpop.permute.xlu0 %1192 }
 0x295   : > { %v3816_v36 = vmax.f32 %v3656_v14, %v1193_v33  ;;  %1278 = vrot.lane.b32.xlu1 %v3811_v49, %s3039_s4 }
 0x296   : > { %v1195_v5 = vpop.permute.xlu1 %1194 }
 0x297   : > { %v3821_v35 = vmax.f32 %v3661_v60, %v1195_v5  ;;  %1288 = vrot.lane.b32.xlu0 %v3816_v36, %s3039_s4 }
 0x298   : > { %v1189_v32 = vpop.permute.xlu0 %1188 }
 0x299   : > { %v3826_v4 = vmax.f32 %v3666_v55, %v1189_v32  ;;  %1290 = vrot.lane.b32.xlu1 %v3821_v35, %s3039_s4 }
 0x29a   : > { %v1191_v29 = vpop.permute.xlu1 %1190 }
 0x29b   : > { %v3831_v14 = vmax.f32 %v3671_v52, %v1191_v29  ;;  %1284 = vrot.lane.b32.xlu0 %v3826_v4, %s3039_s4 }
 0x29d   : > { %1286 = vrot.lane.b32.xlu1 %v3831_v14, %s3039_s4 }
 0x2cf   : > { %v1233_v60 = vpop.permute.xlu0 %1232 }
 0x2d0   : > { %v3838_v58 = vmax.f32 %v3678_v50, %v1233_v60 }
 0x2d2   : > { %1328 = vrot.lane.b32.xlu0 %v3838_v58, %s3040_s5 }
 0x2d3   : > { %v1235_v55 = vpop.permute.xlu1 %1234  ;;  %v1229_v33 = vpop.permute.xlu0 %1228 }
 0x2d4   : > { %v3843_v5 = vmax.f32 %v3683_v61, %v1235_v55  ;;  %v3846_v52 = vmax.f32 %v3686_v59, %v1229_v33 }
 0x2d6   : > { %1330 = vrot.lane.b32.xlu1 %v3843_v5, %s3040_s5  ;;  %1324 = vrot.lane.b32.xlu0 %v3846_v52, %s3040_s5 }
 0x2d7   : > { %v1231_v50 = vpop.permute.xlu1 %1230 }
 0x2d8   : > { %v3853_v32 = vmax.f32 %v3693_v39, %v1231_v50 }
 0x2d9   : > { %v1241_v29 = vpop.permute.xlu0 %1240 }
 0x2da   : > { %v3856_v60 = vmax.f32 %v3696_v20, %v1241_v29  ;;  %1326 = vrot.lane.b32.xlu1 %v3853_v32, %s3040_s5 }
 0x2db   : > { %v1243_v61 = vpop.permute.xlu1 %1242 }
 0x2dc   : > { %v3861_v59 = vmax.f32 %v3701_v31, %v1243_v61  ;;  %1336 = vrot.lane.b32.xlu0 %v3856_v60, %s3040_s5 }
 0x2dd   : > { %v1237_v55 = vpop.permute.xlu0 %1236 }
 0x2de   : > { %v3866_v33 = vmax.f32 %v3706_v10, %v1237_v55  ;;  %1338 = vrot.lane.b32.xlu1 %v3861_v59, %s3040_s5 }
 0x2df   : > { %v1239_v39 = vpop.permute.xlu1 %1238 }
 0x2e0   : > { %v3871_v20 = vmax.f32 %v3711_v18, %v1239_v39  ;;  %1332 = vrot.lane.b32.xlu0 %v3866_v33, %s3040_s5 }
 0x2e1   : > { %v1249_v50 = vpop.permute.xlu0 %1248 }
 0x2e2   : > { %v3876_v31 = vmax.f32 %v3716_v63, %v1249_v50  ;;  %1334 = vrot.lane.b32.xlu1 %v3871_v20, %s3040_s5 }
 0x2e3   : > { %v1251_v29 = vpop.permute.xlu1 %1250 }
 0x2e4   : > { %v3881_v10 = vmax.f32 %v3721_v28, %v1251_v29  ;;  %1344 = vrot.lane.b32.xlu0 %v3876_v31, %s3040_s5 }
 0x2e5   : > { %v1245_v61 = vpop.permute.xlu0 %1244 }
 0x2e6   : > { %v3886_v18 = vmax.f32 %v3726_v37, %v1245_v61  ;;  %1346 = vrot.lane.b32.xlu1 %v3881_v10, %s3040_s5 }
 0x2e7   : > { %v1247_v55 = vpop.permute.xlu1 %1246 }
 0x2e8   : > { %v3891_v63 = vmax.f32 %v3731_v43, %v1247_v55  ;;  %1340 = vrot.lane.b32.xlu0 %v3886_v18, %s3040_s5 }
 0x2e9   : > { %v1257_v39 = vpop.permute.xlu0 %1256 }
 0x2ea   : > { %v3896_v28 = vmax.f32 %v3736_v45, %v1257_v39  ;;  %1342 = vrot.lane.b32.xlu1 %v3891_v63, %s3040_s5 }
 0x2eb   : > { %v1259_v50 = vpop.permute.xlu1 %1258 }
 0x2ec   : > { %v3901_v37 = vmax.f32 %v3741_v19, %v1259_v50  ;;  %1352 = vrot.lane.b32.xlu0 %v3896_v28, %s3040_s5 }
 0x2ed   : > { %v1253_v29 = vpop.permute.xlu0 %1252 }
 0x2ee   : > { %v3906_v43 = vmax.f32 %v3746_v47, %v1253_v29  ;;  %1354 = vrot.lane.b32.xlu1 %v3901_v37, %s3040_s5 }
 0x2ef   : > { %v1255_v61 = vpop.permute.xlu1 %1254 }
 0x2f0   : > { %v3911_v45 = vmax.f32 %v3751_v23, %v1255_v61  ;;  %1348 = vrot.lane.b32.xlu0 %v3906_v43, %s3040_s5 }
 0x2f1   : > { %v1265_v55 = vpop.permute.xlu0 %1264 }
 0x2f2   : > { %v3916_v19 = vmax.f32 %v3756_v25, %v1265_v55  ;;  %1350 = vrot.lane.b32.xlu1 %v3911_v45, %s3040_s5 }
 0x2f3   : > { %v1267_v39 = vpop.permute.xlu1 %1266 }
 0x2f4   : > { %v3921_v47 = vmax.f32 %v3761_v51, %v1267_v39  ;;  %1360 = vrot.lane.b32.xlu0 %v3916_v19, %s3040_s5 }
 0x2f5   : > { %v1261_v50 = vpop.permute.xlu0 %1260 }
 0x2f6   : > { %v3926_v23 = vmax.f32 %v3766_v53, %v1261_v50  ;;  %1362 = vrot.lane.b32.xlu1 %v3921_v47, %s3040_s5 }
 0x2f7   : > { %v1263_v29 = vpop.permute.xlu1 %1262 }
 0x2f8   : > { %v3931_v25 = vmax.f32 %v3771_v40, %v1263_v29  ;;  %1356 = vrot.lane.b32.xlu0 %v3926_v23, %s3040_s5 }
 0x2f9   : > { %v1273_v61 = vpop.permute.xlu0 %1272 }
 0x2fa   : > { %v3936_v51 = vmax.f32 %v3776_v42, %v1273_v61  ;;  %1358 = vrot.lane.b32.xlu1 %v3931_v25, %s3040_s5 }
 0x2fb   : > { %v1275_v55 = vpop.permute.xlu1 %1274 }
 0x2fc   : > { %v3941_v53 = vmax.f32 %v3781_v57, %v1275_v55  ;;  %1368 = vrot.lane.b32.xlu0 %v3936_v51, %s3040_s5 }
 0x2fd   : > { %v1269_v39 = vpop.permute.xlu0 %1268 }
 0x2fe   : > { %v3946_v40 = vmax.f32 %v3786_v0, %v1269_v39  ;;  %1370 = vrot.lane.b32.xlu1 %v3941_v53, %s3040_s5 }
 0x2ff   : > { %v1271_v50 = vpop.permute.xlu1 %1270 }
 0x300   : > { %v3951_v42 = vmax.f32 %v3791_v8, %v1271_v50  ;;  %1364 = vrot.lane.b32.xlu0 %v3946_v40, %s3040_s5 }
 0x301   : > { %v1281_v29 = vpop.permute.xlu0 %1280 }
 0x302   : > { %v3956_v57 = vmax.f32 %v3796_v41, %v1281_v29  ;;  %1366 = vrot.lane.b32.xlu1 %v3951_v42, %s3040_s5 }
 0x303   : > { %v1283_v61 = vpop.permute.xlu1 %1282 }
 0x304   : > { %v3961_v0 = vmax.f32 %v3801_v16, %v1283_v61  ;;  %1376 = vrot.lane.b32.xlu0 %v3956_v57, %s3040_s5 }
 0x305   : > { %v1277_v55 = vpop.permute.xlu0 %1276 }
 0x306   : > { %v3966_v8 = vmax.f32 %v3806_v56, %v1277_v55  ;;  %1378 = vrot.lane.b32.xlu1 %v3961_v0, %s3040_s5 }
 0x307   : > { %v1279_v39 = vpop.permute.xlu1 %1278 }
 0x308   : > { %5041 = vst [vmem:[#allocation10_spill] sm:$0xff] %v3966_v8  ;;  %v3971_v41 = vmax.f32 %v3811_v49, %v1279_v39  ;;  %1372 = vrot.lane.b32.xlu0 %v3966_v8, %s3040_s5 }
 0x309   : > { %v1289_v50 = vpop.permute.xlu0 %1288 }
 0x30a   : > { %5042 = vst [vmem:[#allocation11_spill] sm:$0xff] %v3971_v41  ;;  %v3976_v16 = vmax.f32 %v3816_v36, %v1289_v50  ;;  %1374 = vrot.lane.b32.xlu1 %v3971_v41, %s3040_s5 }
 0x30b   : > { %v1291_v29 = vpop.permute.xlu1 %1290 }
 0x30c   : > { %5043 = vst [vmem:[#allocation12_spill] sm:$0xff] %v3976_v16  ;;  %v3981_v56 = vmax.f32 %v3821_v35, %v1291_v29  ;;  %1384 = vrot.lane.b32.xlu0 %v3976_v16, %s3040_s5 }
 0x30d   : > { %v1285_v61 = vpop.permute.xlu0 %1284 }
 0x30e   : > { %5044 = vst [vmem:[#allocation13_spill] sm:$0xff] %v3981_v56  ;;  %v3986_v49 = vmax.f32 %v3826_v4, %v1285_v61  ;;  %1386 = vrot.lane.b32.xlu1 %v3981_v56, %s3040_s5 }
 0x30f   : > { %v1287_v55 = vpop.permute.xlu1 %1286 }
 0x310   : > { %5045 = vst [vmem:[#allocation14_spill] sm:$0xff] %v3986_v49  ;;  %v3991_v36 = vmax.f32 %v3831_v14, %v1287_v55  ;;  %1380 = vrot.lane.b32.xlu0 %v3986_v49, %s3040_s5 }
 0x312   : > { %5046 = vst [vmem:[#allocation15_spill] sm:$0xff] %v3991_v36  ;;  %1382 = vrot.lane.b32.xlu1 %v3991_v36, %s3040_s5 }
 0x344   : > { %v1329_v35 = vpop.permute.xlu0 %1328 }
 0x345   : > { %v1390_v39 = vmax.f32 %v3838_v58, %v1329_v35 }
 0x347   : > { %v1422_v50 = vsub.f32 %v3208_v3, %v1390_v39 }
 0x348   : > { %v1331_v4 = vpop.permute.xlu1 %1330  ;;  %v1325_v29 = vpop.permute.xlu0 %1324 }
 0x349   : > { %v1456_v61 = vmul.f32 1.442695, %v1422_v50  ;;  %v1391_v56 = vmax.f32 %v3843_v5, %v1331_v4  ;;  %v1388_v16 = vmax.f32 %v3846_v52, %v1325_v29 }
 0x34b   : > { %2883 = vpow2.f32 %v1456_v61  ;;  %v1423_v14 = vsub.f32 %v3214_v11, %v1391_v56  ;;  %v1420_v55 = vsub.f32 %v3210_v7, %v1388_v16 }
 0x34c   : > { %v1327_v49 = vpop.permute.xlu1 %1326 }
 0x34d   : > { %v1458_v41 = vmul.f32 1.442695, %v1423_v14  ;;  %v1452_v36 = vmul.f32 1.442695, %v1420_v55  ;;  %v1389_v8 = vmax.f32 %v3853_v32, %v1327_v49 }
 0x34e   : > { %v1337_v58 = vpop.permute.xlu0 %1336 }
 0x34f   : > { %2885 = vpow2.f32 %v1458_v41  ;;  %v1421_v3 = vsub.f32 %v3218_v15, %v1389_v8  ;;  %v1394_v35 = vmax.f32 %v3856_v60, %v1337_v58 }
 0x350   : > { %2887 = vpow2.f32 %v1452_v36  ;;  %v1339_v5 = vpop.permute.xlu1 %1338 }
 0x351   : > { %v1454_v39 = vmul.f32 1.442695, %v1421_v3  ;;  %v1426_v52 = vsub.f32 %v3224_v21, %v1394_v35  ;;  %v1395_v11 = vmax.f32 %v3861_v59, %v1339_v5 }
 0x352   : > { %v1333_v56 = vpop.permute.xlu0 %1332 }
 0x353   : > { %2889 = vpow2.f32 %v1454_v39  ;;  %v1464_v7 = vmul.f32 1.442695, %v1426_v52  ;;  %v1427_v16 = vsub.f32 %v3226_v26, %v1395_v11  ;;  %v1392_v32 = vmax.f32 %v3866_v33, %v1333_v56 }
 0x354   : > { %v1335_v49 = vpop.permute.xlu1 %1334 }
 0x355   : > { %2891 = vpow2.f32 %v1464_v7  ;;  %v1466_v41 = vmul.f32 1.442695, %v1427_v16  ;;  %v1424_v15 = vsub.f32 %v3230_v30, %v1392_v32  ;;  %v1393_v60 = vmax.f32 %v3871_v20, %v1335_v49 }
 0x356   : > { %v1345_v8 = vpop.permute.xlu0 %1344 }
 0x357   : > { %2893 = vpow2.f32 %v1466_v41  ;;  %v1460_v36 = vmul.f32 1.442695, %v1424_v15  ;;  %v1425_v21 = vsub.f32 %v3234_v38, %v1393_v60  ;;  %v1398_v59 = vmax.f32 %v3876_v31, %v1345_v8 }
 0x358   : > { %v4014_v50 = vpop.eup %2883  ;;  %v1347_v4 = vpop.permute.xlu1 %1346 }
 0x359   : > { %2895 = vpow2.f32 %v1460_v36  ;;  %v1462_v26 = vmul.f32 1.442695, %v1425_v21  ;;  %v1430_v33 = vsub.f32 %v3238_v44, %v1398_v59  ;;  %v1399_v29 = vmax.f32 %v3881_v10, %v1347_v4  ;;  %1520 = vrot.lane.b32.xlu0 %v4014_v50, %s3036_s29 }
 0x35a   : > { %v1341_v30 = vpop.permute.xlu0 %1340 }
 0x35b   : > { %2897 = vpow2.f32 %v1462_v26  ;;  %v1472_v20 = vmul.f32 1.442695, %v1430_v33  ;;  %v1431_v61 = vsub.f32 %v3242_v1, %v1399_v29  ;;  %v1396_v38 = vmax.f32 %v3886_v18, %v1341_v30 }
 0x35c   : > { %v4022_v31 = vpop.eup %2885  ;;  %v1343_v14 = vpop.permute.xlu1 %1342 }
 0x35d   : > { %v4024_v55 = vpop.eup %2887  ;;  %2899 = vpow2.f32 %v1472_v20  ;;  %v1474_v58 = vmul.f32 1.442695, %v1431_v61  ;;  %v1428_v44 = vsub.f32 %v3247_v6, %v1396_v38  ;;  %v1397_v10 = vmax.f32 %v3891_v63, %v1343_v14  ;;  %1522 = vrot.lane.b32.xlu1 %v4022_v31, %s3036_s29 }
 0x35e   : > { %1516 = vrot.lane.b32.xlu0 %v4024_v55, %s3036_s29  ;;  %v1353_v1 = vpop.permute.xlu0 %1352 }
 0x35f   : > { %2901 = vpow2.f32 %v1474_v58  ;;  %v1468_v18 = vmul.f32 1.442695, %v1428_v44  ;;  %v1429_v3 = vsub.f32 %v3252_v9, %v1397_v10  ;;  %v1402_v35 = vmax.f32 %v3896_v28, %v1353_v1 }
 0x360   : > { %v4034_v5 = vpop.eup %2889  ;;  %v1355_v39 = vpop.permute.xlu1 %1354 }
 0x361   : > { %2903 = vpow2.f32 %v1468_v18  ;;  %v1470_v6 = vmul.f32 1.442695, %v1429_v3  ;;  %v1434_v63 = vsub.f32 %v3256_v12, %v1402_v35  ;;  %v1403_v52 = vmax.f32 %v3901_v37, %v1355_v39  ;;  %1518 = vrot.lane.b32.xlu1 %v4034_v5, %s3036_s29 }
 0x362   : > { %v4040_v11 = vpop.eup %2891  ;;  %v1349_v56 = vpop.permute.xlu0 %1348 }
 0x363   : > { %2905 = vpow2.f32 %v1470_v6  ;;  %v1480_v7 = vmul.f32 1.442695, %v1434_v63  ;;  %v1435_v9 = vsub.f32 %v3262_v17, %v1403_v52  ;;  %v1400_v28 = vmax.f32 %v3906_v43, %v1349_v56  ;;  %1528 = vrot.lane.b32.xlu0 %v4040_v11, %s3036_s29 }
 0x364   : > { %v4046_v16 = vpop.eup %2893  ;;  %v1351_v12 = vpop.permute.xlu1 %1350 }
 0x365   : > { %2907 = vpow2.f32 %v1480_v7  ;;  %v1482_v37 = vmul.f32 1.442695, %v1435_v9  ;;  %v1432_v32 = vsub.f32 %v3267_v22, %v1400_v28  ;;  %v1401_v49 = vmax.f32 %v3911_v45, %v1351_v12  ;;  %1530 = vrot.lane.b32.xlu1 %v4046_v16, %s3036_s29  ;;  %v5047_v7 = vld [vmem:[#allocation2_spill] sm:$0xff] }
 0x366   : > { %v4052_v41 = vpop.eup %2895  ;;  %v1361_v17 = vpop.permute.xlu0 %1360 }
 0x367   : > { %2909 = vpow2.f32 %v1482_v37  ;;  %v1476_v43 = vmul.f32 1.442695, %v1432_v32  ;;  %v1433_v15 = vsub.f32 %v3272_v24, %v1401_v49  ;;  %v1406_v60 = vmax.f32 %v3916_v19, %v1361_v17  ;;  %1524 = vrot.lane.b32.xlu0 %v4052_v41, %s3036_s29  ;;  %v5048_v37 = vld [vmem:[#allocation3_spill] sm:$0xff]  ;;  %v5049_v49 = vld [vmem:[#allocation10_spill] sm:$0xff] }
 0x368   : > { %v4058_v8 = vpop.eup %2897  ;;  %v1363_v22 = vpop.permute.xlu1 %1362 }
 0x369   : > { %2911 = vpow2.f32 %v1476_v43  ;;  %v1478_v45 = vmul.f32 1.442695, %v1433_v15  ;;  %v1438_v36 = vsub.f32 %v3276_v27, %v1406_v60  ;;  %v1407_v21 = vmax.f32 %v3921_v47, %v1363_v22  ;;  %1526 = vrot.lane.b32.xlu1 %v4058_v8, %s3036_s29  ;;  %v5050_v60 = vld [vmem:[#allocation4_spill] sm:$0xff] }
 0x36a   : > { %v4064_v59 = vpop.eup %2899  ;;  %v1357_v24 = vpop.permute.xlu0 %1356 }
 0x36b   : > { %2913 = vpow2.f32 %v1478_v45  ;;  %v1488_v19 = vmul.f32 1.442695, %v1438_v36  ;;  %v1439_v4 = vsub.f32 %v3282_v34, %v1407_v21  ;;  %v1404_v26 = vmax.f32 %v3926_v23, %v1357_v24  ;;  %1536 = vrot.lane.b32.xlu0 %v4064_v59, %s3036_s29  ;;  %v5051_v45 = vld [vmem:[#allocation11_spill] sm:$0xff] }
 0x36c   : > { %v4070_v33 = vpop.eup %2901  ;;  %v1359_v27 = vpop.permute.xlu1 %1358 }
 0x36d   : > { %2915 = vpow2.f32 %v1488_v19  ;;  %v1490_v47 = vmul.f32 1.442695, %v1439_v4  ;;  %v1436_v29 = vsub.f32 %v3287_v62, %v1404_v26  ;;  %v1405_v30 = vmax.f32 %v3931_v25, %v1359_v27  ;;  %1538 = vrot.lane.b32.xlu1 %v4070_v33, %s3036_s29  ;;  %v5052_v4 = vld [vmem:[#allocation5_spill] sm:$0xff]  ;;  %v5053_v27 = vld [vmem:[#allocation12_spill] sm:$0xff] }
 0x36e   : > { %v4076_v20 = vpop.eup %2903  ;;  %v1369_v34 = vpop.permute.xlu0 %1368 }
 0x36f   : > { %2917 = vpow2.f32 %v1490_v47  ;;  %v1484_v23 = vmul.f32 1.442695, %v1436_v29  ;;  %v1437_v61 = vsub.f32 %v3292_v46, %v1405_v30  ;;  %v1410_v38 = vmax.f32 %v3936_v51, %v1369_v34  ;;  %1532 = vrot.lane.b32.xlu0 %v4076_v20, %s3036_s29 }
 0x370   : > { %v4082_v14 = vpop.eup %2905  ;;  %v1371_v62 = vpop.permute.xlu1 %1370 }
 0x371   : > { %2919 = vpow2.f32 %v1484_v23  ;;  %v1486_v25 = vmul.f32 1.442695, %v1437_v61  ;;  %v1442_v58 = vsub.f32 %v3296_v2, %v1410_v38  ;;  %v1411_v44 = vmax.f32 %v3941_v53, %v1371_v62  ;;  %1534 = vrot.lane.b32.xlu1 %v4082_v14, %s3036_s29  ;;  %v5055_v23 = vld [vmem:[#allocation6_spill] sm:$0xff]  ;;  %v5056_v38 = vld [vmem:[#allocation13_spill] sm:$0xff] }
 0x372   : > { %v4088_v10 = vpop.eup %2907  ;;  %v1365_v46 = vpop.permute.xlu0 %1364 }
 0x373   : > { %2921 = vpow2.f32 %v1486_v25  ;;  %v1496_v51 = vmul.f32 1.442695, %v1442_v58  ;;  %v1443_v1 = vsub.f32 %v3302_v48, %v1411_v44  ;;  %v1408_v18 = vmax.f32 %v3946_v40, %v1365_v46  ;;  %1544 = vrot.lane.b32.xlu0 %v4088_v10, %s3036_s29  ;;  %v5058_v46 = vld [vmem:[#allocation7_spill] sm:$0xff] }
 0x374   : > { %v4094_v3 = vpop.eup %2909  ;;  %v1367_v2 = vpop.permute.xlu1 %1366 }
 0x375   : > { %2923 = vpow2.f32 %v1496_v51  ;;  %v1498_v53 = vmul.f32 1.442695, %v1443_v1  ;;  %v1440_v35 = vsub.f32 %v3307_v13, %v1408_v18  ;;  %v1409_v39 = vmax.f32 %v3951_v42, %v1367_v2  ;;  %1546 = vrot.lane.b32.xlu1 %v4094_v3, %s3036_s29  ;;  %v5059_v1 = vld [vmem:[#allocation14_spill] sm:$0xff] }
 0x376   : > { %v4100_v6 = vpop.eup %2911  ;;  %v1377_v48 = vpop.permute.xlu0 %1376 }
 0x377   : > { %2925 = vpow2.f32 %v1498_v53  ;;  %v1492_v40 = vmul.f32 1.442695, %v1440_v35  ;;  %v1441_v63 = vsub.f32 %v3312_v54, %v1409_v39  ;;  %v1414_v52 = vmax.f32 %v3956_v57, %v1377_v48  ;;  %1540 = vrot.lane.b32.xlu0 %v4100_v6, %s3036_s29  ;;  %v5061_v39 = vld [vmem:[#allocation8_spill] sm:$0xff] }
 0x378   : > { %v4106_v56 = vpop.eup %2913  ;;  %v1379_v13 = vpop.permute.xlu1 %1378 }
 0x379   : > { %2927 = vpow2.f32 %v1492_v40  ;;  %v1494_v42 = vmul.f32 1.442695, %v1441_v63  ;;  %v1446_v9 = vsub.f32 %v5047_v7, %v1414_v52  ;;  %v1415_v28 = vmax.f32 %v3961_v0, %v1379_v13  ;;  %1542 = vrot.lane.b32.xlu1 %v4106_v56, %s3036_s29  ;;  %v5062_v40 = vld [vmem:[#allocation15_spill] sm:$0xff] }
 0x37a   : > { %v4112_v12 = vpop.eup %2915  ;;  %v1373_v54 = vpop.permute.xlu0 %1372 }
 0x37b   : > { %2929 = vpow2.f32 %v1494_v42  ;;  %v1504_v57 = vmul.f32 1.442695, %v1446_v9  ;;  %v1447_v32 = vsub.f32 %v5048_v37, %v1415_v28  ;;  %v1412_v17 = vmax.f32 %v5049_v49, %v1373_v54  ;;  %1552 = vrot.lane.b32.xlu0 %v4112_v12, %s3036_s29  ;;  %v5064_v42 = vld [vmem:[#allocation9_spill] sm:$0xff] }
 0x37c   : > { %v4118_v43 = vpop.eup %2917  ;;  %v1375_v15 = vpop.permute.xlu1 %1374 }
 0x37d   : > { %2931 = vpow2.f32 %v1504_v57  ;;  %v1506_v0 = vmul.f32 1.442695, %v1447_v32  ;;  %v1444_v22 = vsub.f32 %v5050_v60, %v1412_v17  ;;  %v1413_v36 = vmax.f32 %v5051_v45, %v1375_v15  ;;  %1554 = vrot.lane.b32.xlu1 %v4118_v43, %s3036_s29 }
 0x37e   : > { %v4124_v21 = vpop.eup %2919  ;;  %v1385_v24 = vpop.permute.xlu0 %1384 }
 0x37f   : > { %2933 = vpow2.f32 %v1506_v0  ;;  %v1500_v19 = vmul.f32 1.442695, %v1444_v22  ;;  %v1445_v26 = vsub.f32 %v5052_v4, %v1413_v36  ;;  %v1418_v47 = vmax.f32 %v5053_v27, %v1385_v24  ;;  %1548 = vrot.lane.b32.xlu0 %v4124_v21, %s3036_s29 }
 0x380   : > { %v4130_v29 = vpop.eup %2921  ;;  %v1387_v30 = vpop.permute.xlu1 %1386 }
 0x381   : > { %5054 = vst [vmem:[#allocation2_spill] sm:$0xff] %v4130_v29  ;;  %2935 = vpow2.f32 %v1500_v19  ;;  %v1502_v34 = vmul.f32 1.442695, %v1445_v26  ;;  %v1450_v61 = vsub.f32 %v5055_v23, %v1418_v47  ;;  %v1419_v62 = vmax.f32 %v5056_v38, %v1387_v30  ;;  %1550 = vrot.lane.b32.xlu1 %v4130_v29, %s3036_s29 }
 0x382   : > { %v4136_v25 = vpop.eup %2923  ;;  %v1381_v58 = vpop.permute.xlu0 %1380 }
 0x383   : > { %5057 = vst [vmem:[#allocation3_spill] sm:$0xff] %v4136_v25  ;;  %2937 = vpow2.f32 %v1502_v34  ;;  %v1512_v44 = vmul.f32 1.442695, %v1450_v61  ;;  %v1451_v51 = vsub.f32 %v5058_v46, %v1419_v62  ;;  %v1416_v18 = vmax.f32 %v5059_v1, %v1381_v58  ;;  %1560 = vrot.lane.b32.xlu0 %v4136_v25, %s3036_s29 }
 0x384   : > { %v4142_v2 = vpop.eup %2925  ;;  %v1383_v53 = vpop.permute.xlu1 %1382 }
 0x385   : > { %5060 = vst [vmem:[#allocation10_spill] sm:$0xff] %v4142_v2  ;;  %2939 = vpow2.f32 %v1512_v44  ;;  %v1514_v35 = vmul.f32 1.442695, %v1451_v51  ;;  %v1448_v48 = vsub.f32 %v5061_v39, %v1416_v18  ;;  %v1417_v63 = vmax.f32 %v5062_v40, %v1383_v53  ;;  %1562 = vrot.lane.b32.xlu1 %v4142_v2, %s3036_s29 }
 0x386   : > { %v4148_v52 = vpop.eup %2927 }
 0x387   : > { %5063 = vst [vmem:[#allocation4_spill] sm:$0xff] %v4148_v52  ;;  %2941 = vpow2.f32 %v1514_v35  ;;  %v1508_v13 = vmul.f32 1.442695, %v1448_v48  ;;  %v1449_v7 = vsub.f32 %v5064_v42, %v1417_v63  ;;  %1556 = vrot.lane.b32.xlu0 %v4148_v52, %s3036_s29 }
 0x388   : > { %v4153_v9 = vpop.eup %2929 }
 0x389   : > { %5065 = vst [vmem:[#allocation11_spill] sm:$0xff] %v4153_v9  ;;  %2943 = vpow2.f32 %v1508_v13  ;;  %v1510_v28 = vmul.f32 1.442695, %v1449_v7  ;;  %1558 = vrot.lane.b32.xlu1 %v4153_v9, %s3036_s29 }
 0x38a   : > { %v4157_v54 = vpop.eup %2931 }
 0x38b   : > { %5066 = vst [vmem:[#allocation5_spill] sm:$0xff] %v4157_v54  ;;  %2945 = vpow2.f32 %v1510_v28  ;;  %1568 = vrot.lane.b32.xlu0 %v4157_v54, %s3036_s29 }
 0x38c   : > { %v4161_v57 = vpop.eup %2933 }
 0x38d   : > { %5067 = vst [vmem:[#allocation12_spill] sm:$0xff] %v4161_v57  ;;  %1570 = vrot.lane.b32.xlu1 %v4161_v57, %s3036_s29 }
 0x38e   : > { %v4165_v37 = vpop.eup %2935 }
 0x38f   : > { %5068 = vst [vmem:[#allocation6_spill] sm:$0xff] %v4165_v37  ;;  %1564 = vrot.lane.b32.xlu0 %v4165_v37, %s3036_s29 }
 0x390   : > { %v4169_v32 = vpop.eup %2937 }
 0x391   : > { %5069 = vst [vmem:[#allocation13_spill] sm:$0xff] %v4169_v32  ;;  %1566 = vrot.lane.b32.xlu1 %v4169_v32, %s3036_s29 }
 0x392   : > { %v4173_v49 = vpop.eup %2939 }
 0x393   : > { %5070 = vst [vmem:[#allocation7_spill] sm:$0xff] %v4173_v49  ;;  %1576 = vrot.lane.b32.xlu0 %v4173_v49, %s3036_s29 }
 0x394   : > { %v4177_v17 = vpop.eup %2941 }
 0x395   : > { %5071 = vst [vmem:[#allocation14_spill] sm:$0xff] %v4177_v17  ;;  %1578 = vrot.lane.b32.xlu1 %v4177_v17, %s3036_s29 }
 0x396   : > { %v4181_v15 = vpop.eup %2943 }
 0x397   : > { %5072 = vst [vmem:[#allocation8_spill] sm:$0xff] %v4181_v15  ;;  %1572 = vrot.lane.b32.xlu0 %v4181_v15, %s3036_s29 }
 0x398   : > { %v4185_v0 = vpop.eup %2945 }
 0x399   : > { %5073 = vst [vmem:[#allocation15_spill] sm:$0xff] %v4185_v0  ;;  %1574 = vrot.lane.b32.xlu1 %v4185_v0, %s3036_s29 }
 0x3cb   : > { %v1521_v60 = vpop.permute.xlu0 %1520 }
 0x3cc   : > { %v4190_v22 = vadd.f32 %v4014_v50, %v1521_v60 }
 0x3ce   : > { %1616 = vrot.lane.b32.xlu0 %v4190_v22, %s3037_s30 }
 0x3cf   : > { %v1523_v45 = vpop.permute.xlu1 %1522 }
 0x3d0   : > { %v4195_v36 = vadd.f32 %v4022_v31, %v1523_v45  ;;  %v1517_v24 = vpop.permute.xlu0 %1516 }
 0x3d1   : > { %v4198_v19 = vadd.f32 %v4024_v55, %v1517_v24 }
 0x3d2   : > { %1618 = vrot.lane.b32.xlu1 %v4195_v36, %s3037_s30 }
 0x3d3   : > { %1612 = vrot.lane.b32.xlu0 %v4198_v19, %s3037_s30  ;;  %v1519_v4 = vpop.permute.xlu1 %1518 }
 0x3d4   : > { %v4205_v26 = vadd.f32 %v4034_v5, %v1519_v4 }
 0x3d5   : > { %v1529_v27 = vpop.permute.xlu0 %1528 }
 0x3d6   : > { %v4208_v47 = vadd.f32 %v4040_v11, %v1529_v27  ;;  %1614 = vrot.lane.b32.xlu1 %v4205_v26, %s3037_s30 }
 0x3d7   : > { %v1531_v30 = vpop.permute.xlu1 %1530 }
 0x3d8   : > { %v4213_v34 = vadd.f32 %v4046_v16, %v1531_v30  ;;  %1624 = vrot.lane.b32.xlu0 %v4208_v47, %s3037_s30 }
 0x3d9   : > { %v1525_v23 = vpop.permute.xlu0 %1524 }
 0x3da   : > { %v4218_v61 = vadd.f32 %v4052_v41, %v1525_v23  ;;  %1626 = vrot.lane.b32.xlu1 %v4213_v34, %s3037_s30 }
 0x3db   : > { %v1527_v38 = vpop.permute.xlu1 %1526 }
 0x3dc   : > { %v4223_v62 = vadd.f32 %v4058_v8, %v1527_v38  ;;  %1620 = vrot.lane.b32.xlu0 %v4218_v61, %s3037_s30 }
 0x3dd   : > { %v1537_v58 = vpop.permute.xlu0 %1536 }
 0x3de   : > { %v4228_v44 = vadd.f32 %v4064_v59, %v1537_v58  ;;  %1622 = vrot.lane.b32.xlu1 %v4223_v62, %s3037_s30 }
 0x3df   : > { %v1539_v46 = vpop.permute.xlu1 %1538 }
 0x3e0   : > { %v4233_v51 = vadd.f32 %v4070_v33, %v1539_v46  ;;  %1632 = vrot.lane.b32.xlu0 %v4228_v44, %s3037_s30 }
 0x3e1   : > { %v1533_v1 = vpop.permute.xlu0 %1532 }
 0x3e2   : > { %v4238_v18 = vadd.f32 %v4076_v20, %v1533_v1  ;;  %1634 = vrot.lane.b32.xlu1 %v4233_v51, %s3037_s30 }
 0x3e3   : > { %v1535_v53 = vpop.permute.xlu1 %1534 }
 0x3e4   : > { %v4243_v35 = vadd.f32 %v4082_v14, %v1535_v53  ;;  %1628 = vrot.lane.b32.xlu0 %v4238_v18, %s3037_s30 }
 0x3e5   : > { %v1545_v39 = vpop.permute.xlu0 %1544 }
 0x3e6   : > { %v4248_v48 = vadd.f32 %v4088_v10, %v1545_v39  ;;  %1630 = vrot.lane.b32.xlu1 %v4243_v35, %s3037_s30 }
 0x3e7   : > { %v1547_v40 = vpop.permute.xlu1 %1546 }
 0x3e8   : > { %v4253_v63 = vadd.f32 %v4094_v3, %v1547_v40  ;;  %1640 = vrot.lane.b32.xlu0 %v4248_v48, %s3037_s30 }
 0x3e9   : > { %v1541_v13 = vpop.permute.xlu0 %1540 }
 0x3ea   : > { %v4258_v42 = vadd.f32 %v4100_v6, %v1541_v13  ;;  %1642 = vrot.lane.b32.xlu1 %v4253_v63, %s3037_s30 }
 0x3eb   : > { %v1543_v7 = vpop.permute.xlu1 %1542 }
 0x3ec   : > { %v4263_v28 = vadd.f32 %v4106_v56, %v1543_v7  ;;  %1636 = vrot.lane.b32.xlu0 %v4258_v42, %s3037_s30 }
 0x3ed   : > { %v1553_v60 = vpop.permute.xlu0 %1552 }
 0x3ee   : > { %v4268_v45 = vadd.f32 %v4112_v12, %v1553_v60  ;;  %1638 = vrot.lane.b32.xlu1 %v4263_v28, %s3037_s30 }
 0x3ef   : > { %v1555_v24 = vpop.permute.xlu1 %1554 }
 0x3f0   : > { %v4273_v4 = vadd.f32 %v4118_v43, %v1555_v24  ;;  %1648 = vrot.lane.b32.xlu0 %v4268_v45, %s3037_s30 }
 0x3f1   : > { %v1549_v27 = vpop.permute.xlu0 %1548 }
 0x3f2   : > { %v4278_v30 = vadd.f32 %v4124_v21, %v1549_v27  ;;  %1650 = vrot.lane.b32.xlu1 %v4273_v4, %s3037_s30 }
 0x3f3   : > { %v1551_v23 = vpop.permute.xlu1 %1550 }
 0x3f4   : > { %v4283_v38 = vadd.f32 %v4130_v29, %v1551_v23  ;;  %1644 = vrot.lane.b32.xlu0 %v4278_v30, %s3037_s30 }
 0x3f5   : > { %v1561_v58 = vpop.permute.xlu0 %1560 }
 0x3f6   : > { %v4288_v46 = vadd.f32 %v4136_v25, %v1561_v58  ;;  %1646 = vrot.lane.b32.xlu1 %v4283_v38, %s3037_s30 }
 0x3f7   : > { %v1563_v1 = vpop.permute.xlu1 %1562 }
 0x3f8   : > { %v4293_v53 = vadd.f32 %v4142_v2, %v1563_v1  ;;  %1656 = vrot.lane.b32.xlu0 %v4288_v46, %s3037_s30 }
 0x3f9   : > { %v1557_v39 = vpop.permute.xlu0 %1556 }
 0x3fa   : > { %v4298_v40 = vadd.f32 %v4148_v52, %v1557_v39  ;;  %1658 = vrot.lane.b32.xlu1 %v4293_v53, %s3037_s30 }
 0x3fb   : > { %v1559_v13 = vpop.permute.xlu1 %1558 }
 0x3fc   : > { %v4303_v7 = vadd.f32 %v4153_v9, %v1559_v13  ;;  %1652 = vrot.lane.b32.xlu0 %v4298_v40, %s3037_s30 }
 0x3fd   : > { %v1569_v60 = vpop.permute.xlu0 %1568 }
 0x3fe   : > { %v4308_v24 = vadd.f32 %v4157_v54, %v1569_v60  ;;  %1654 = vrot.lane.b32.xlu1 %v4303_v7, %s3037_s30 }
 0x3ff   : > { %v1571_v27 = vpop.permute.xlu1 %1570 }
 0x400   : > { %v4313_v23 = vadd.f32 %v4161_v57, %v1571_v27  ;;  %1664 = vrot.lane.b32.xlu0 %v4308_v24, %s3037_s30 }
 0x401   : > { %v1565_v58 = vpop.permute.xlu0 %1564 }
 0x402   : > { %v4318_v1 = vadd.f32 %v4165_v37, %v1565_v58  ;;  %1666 = vrot.lane.b32.xlu1 %v4313_v23, %s3037_s30 }
 0x403   : > { %v1567_v39 = vpop.permute.xlu1 %1566 }
 0x404   : > { %v4323_v13 = vadd.f32 %v4169_v32, %v1567_v39  ;;  %1660 = vrot.lane.b32.xlu0 %v4318_v1, %s3037_s30 }
 0x405   : > { %v1577_v60 = vpop.permute.xlu0 %1576 }
 0x406   : > { %v4328_v27 = vadd.f32 %v4173_v49, %v1577_v60  ;;  %1662 = vrot.lane.b32.xlu1 %v4323_v13, %s3037_s30 }
 0x407   : > { %v1579_v57 = vpop.permute.xlu1 %1578 }
 0x408   : > { %v4333_v58 = vadd.f32 %v4177_v17, %v1579_v57  ;;  %1672 = vrot.lane.b32.xlu0 %v4328_v27, %s3037_s30 }
 0x409   : > { %v1573_v37 = vpop.permute.xlu0 %1572 }
 0x40a   : > { %v4338_v39 = vadd.f32 %v4181_v15, %v1573_v37  ;;  %1674 = vrot.lane.b32.xlu1 %v4333_v58, %s3037_s30 }
 0x40b   : > { %v1575_v32 = vpop.permute.xlu1 %1574 }
 0x40c   : > { %v4343_v60 = vadd.f32 %v4185_v0, %v1575_v32  ;;  %1668 = vrot.lane.b32.xlu0 %v4338_v39, %s3037_s30 }
 0x40e   : > { %1670 = vrot.lane.b32.xlu1 %v4343_v60, %s3037_s30 }
 0x440   : > { %v1617_v57 = vpop.permute.xlu0 %1616 }
 0x441   : > { %v4350_v17 = vadd.f32 %v1617_v57, %v4190_v22 }
 0x443   : > { %1712 = vrot.lane.b32.xlu0 %v4350_v17, %s3038_s3 }
 0x444   : > { %v1619_v37 = vpop.permute.xlu1 %1618 }
 0x445   : > { %v4355_v49 = vadd.f32 %v1619_v37, %v4195_v36  ;;  %v1613_v15 = vpop.permute.xlu0 %1612 }
 0x446   : > { %v4358_v32 = vadd.f32 %v1613_v15, %v4198_v19 }
 0x447   : > { %1714 = vrot.lane.b32.xlu1 %v4355_v49, %s3038_s3 }
 0x448   : > { %1708 = vrot.lane.b32.xlu0 %v4358_v32, %s3038_s3  ;;  %v1615_v0 = vpop.permute.xlu1 %1614 }
 0x449   : > { %v4365_v22 = vadd.f32 %v1615_v0, %v4205_v26 }
 0x44a   : > { %v1625_v57 = vpop.permute.xlu0 %1624 }
 0x44b   : > { %v4368_v54 = vadd.f32 %v1625_v57, %v4208_v47  ;;  %1710 = vrot.lane.b32.xlu1 %v4365_v22, %s3038_s3 }
 0x44c   : > { %v1627_v36 = vpop.permute.xlu1 %1626 }
 0x44d   : > { %v4373_v15 = vadd.f32 %v1627_v36, %v4213_v34  ;;  %1720 = vrot.lane.b32.xlu0 %v4368_v54, %s3038_s3 }
 0x44e   : > { %v1621_v19 = vpop.permute.xlu0 %1620 }
 0x44f   : > { %v4378_v37 = vadd.f32 %v1621_v19, %v4218_v61  ;;  %1722 = vrot.lane.b32.xlu1 %v4373_v15, %s3038_s3 }
 0x450   : > { %v1623_v0 = vpop.permute.xlu1 %1622 }
 0x451   : > { %v4383_v26 = vadd.f32 %v1623_v0, %v4223_v62  ;;  %1716 = vrot.lane.b32.xlu0 %v4378_v37, %s3038_s3 }
 0x452   : > { %v1633_v47 = vpop.permute.xlu0 %1632 }
 0x453   : > { %v4388_v34 = vadd.f32 %v1633_v47, %v4228_v44  ;;  %1718 = vrot.lane.b32.xlu1 %v4383_v26, %s3038_s3 }
 0x454   : > { %v1635_v57 = vpop.permute.xlu1 %1634 }
 0x455   : > { %v4393_v61 = vadd.f32 %v1635_v57, %v4233_v51  ;;  %1728 = vrot.lane.b32.xlu0 %v4388_v34, %s3038_s3 }
 0x456   : > { %v1629_v36 = vpop.permute.xlu0 %1628 }
 0x457   : > { %v4398_v62 = vadd.f32 %v1629_v36, %v4238_v18  ;;  %1730 = vrot.lane.b32.xlu1 %v4393_v61, %s3038_s3 }
 0x458   : > { %v1631_v19 = vpop.permute.xlu1 %1630 }
 0x459   : > { %v4403_v44 = vadd.f32 %v1631_v19, %v4243_v35  ;;  %1724 = vrot.lane.b32.xlu0 %v4398_v62, %s3038_s3 }
 0x45a   : > { %v1641_v0 = vpop.permute.xlu0 %1640 }
 0x45b   : > { %v4408_v51 = vadd.f32 %v1641_v0, %v4248_v48  ;;  %1726 = vrot.lane.b32.xlu1 %v4403_v44, %s3038_s3 }
 0x45c   : > { %v1643_v47 = vpop.permute.xlu1 %1642 }
 0x45d   : > { %v4413_v18 = vadd.f32 %v1643_v47, %v4253_v63  ;;  %1736 = vrot.lane.b32.xlu0 %v4408_v51, %s3038_s3 }
 0x45e   : > { %v1637_v57 = vpop.permute.xlu0 %1636 }
 0x45f   : > { %v4418_v35 = vadd.f32 %v1637_v57, %v4258_v42  ;;  %1738 = vrot.lane.b32.xlu1 %v4413_v18, %s3038_s3 }
 0x460   : > { %v1639_v36 = vpop.permute.xlu1 %1638 }
 0x461   : > { %v4423_v48 = vadd.f32 %v1639_v36, %v4263_v28  ;;  %1732 = vrot.lane.b32.xlu0 %v4418_v35, %s3038_s3 }
 0x462   : > { %v1649_v19 = vpop.permute.xlu0 %1648 }
 0x463   : > { %v4428_v63 = vadd.f32 %v1649_v19, %v4268_v45  ;;  %1734 = vrot.lane.b32.xlu1 %v4423_v48, %s3038_s3 }
 0x464   : > { %v1651_v0 = vpop.permute.xlu1 %1650 }
 0x465   : > { %v4433_v42 = vadd.f32 %v1651_v0, %v4273_v4  ;;  %1744 = vrot.lane.b32.xlu0 %v4428_v63, %s3038_s3 }
 0x466   : > { %v1645_v47 = vpop.permute.xlu0 %1644 }
 0x467   : > { %v4438_v28 = vadd.f32 %v1645_v47, %v4278_v30  ;;  %1746 = vrot.lane.b32.xlu1 %v4433_v42, %s3038_s3 }
 0x468   : > { %v1647_v57 = vpop.permute.xlu1 %1646 }
 0x469   : > { %v4443_v45 = vadd.f32 %v1647_v57, %v4283_v38  ;;  %1740 = vrot.lane.b32.xlu0 %v4438_v28, %s3038_s3 }
 0x46a   : > { %v1657_v36 = vpop.permute.xlu0 %1656 }
 0x46b   : > { %v4448_v4 = vadd.f32 %v1657_v36, %v4288_v46  ;;  %1742 = vrot.lane.b32.xlu1 %v4443_v45, %s3038_s3 }
 0x46c   : > { %v1659_v19 = vpop.permute.xlu1 %1658 }
 0x46d   : > { %v4453_v30 = vadd.f32 %v1659_v19, %v4293_v53  ;;  %1752 = vrot.lane.b32.xlu0 %v4448_v4, %s3038_s3 }
 0x46e   : > { %v1653_v0 = vpop.permute.xlu0 %1652 }
 0x46f   : > { %v4458_v38 = vadd.f32 %v1653_v0, %v4298_v40  ;;  %1754 = vrot.lane.b32.xlu1 %v4453_v30, %s3038_s3 }
 0x470   : > { %v1655_v47 = vpop.permute.xlu1 %1654 }
 0x471   : > { %v4463_v46 = vadd.f32 %v1655_v47, %v4303_v7  ;;  %1748 = vrot.lane.b32.xlu0 %v4458_v38, %s3038_s3 }
 0x472   : > { %v1665_v57 = vpop.permute.xlu0 %1664 }
 0x473   : > { %v4468_v53 = vadd.f32 %v1665_v57, %v4308_v24  ;;  %1750 = vrot.lane.b32.xlu1 %v4463_v46, %s3038_s3 }
 0x474   : > { %v1667_v36 = vpop.permute.xlu1 %1666 }
 0x475   : > { %v4473_v40 = vadd.f32 %v1667_v36, %v4313_v23  ;;  %1760 = vrot.lane.b32.xlu0 %v4468_v53, %s3038_s3 }
 0x476   : > { %v1661_v19 = vpop.permute.xlu0 %1660 }
 0x477   : > { %v4478_v7 = vadd.f32 %v1661_v19, %v4318_v1  ;;  %1762 = vrot.lane.b32.xlu1 %v4473_v40, %s3038_s3 }
 0x478   : > { %v1663_v0 = vpop.permute.xlu1 %1662 }
 0x479   : > { %v4483_v24 = vadd.f32 %v1663_v0, %v4323_v13  ;;  %1756 = vrot.lane.b32.xlu0 %v4478_v7, %s3038_s3 }
 0x47a   : > { %v1673_v47 = vpop.permute.xlu0 %1672 }
 0x47b   : > { %v4488_v23 = vadd.f32 %v1673_v47, %v4328_v27  ;;  %1758 = vrot.lane.b32.xlu1 %v4483_v24, %s3038_s3 }
 0x47c   : > { %v1675_v57 = vpop.permute.xlu1 %1674 }
 0x47d   : > { %v4493_v1 = vadd.f32 %v1675_v57, %v4333_v58  ;;  %1768 = vrot.lane.b32.xlu0 %v4488_v23, %s3038_s3 }
 0x47e   : > { %v1669_v36 = vpop.permute.xlu0 %1668 }
 0x47f   : > { %v4498_v13 = vadd.f32 %v1669_v36, %v4338_v39  ;;  %1770 = vrot.lane.b32.xlu1 %v4493_v1, %s3038_s3 }
 0x480   : > { %v1671_v19 = vpop.permute.xlu1 %1670 }
 0x481   : > { %v4503_v27 = vadd.f32 %v1671_v19, %v4343_v60  ;;  %1764 = vrot.lane.b32.xlu0 %v4498_v13, %s3038_s3 }
 0x483   : > { %1766 = vrot.lane.b32.xlu1 %v4503_v27, %s3038_s3 }
 0x4b5   : > { %v1713_v58 = vpop.permute.xlu0 %1712 }
 0x4b6   : > { %v4510_v0 = vadd.f32 %v1713_v58, %v4350_v17 }
 0x4b8   : > { %1808 = vrot.lane.b32.xlu0 %v4510_v0, %s3039_s4 }
 0x4b9   : > { %v1715_v39 = vpop.permute.xlu1 %1714 }
 0x4ba   : > { %v4515_v47 = vadd.f32 %v1715_v39, %v4355_v49  ;;  %v1709_v57 = vpop.permute.xlu0 %1708 }
 0x4bb   : > { %v4518_v60 = vadd.f32 %v1709_v57, %v4358_v32 }
 0x4bc   : > { %1810 = vrot.lane.b32.xlu1 %v4515_v47, %s3039_s4 }
 0x4bd   : > { %1804 = vrot.lane.b32.xlu0 %v4518_v60, %s3039_s4  ;;  %v1711_v36 = vpop.permute.xlu1 %1710 }
 0x4be   : > { %v4525_v17 = vadd.f32 %v1711_v36, %v4365_v22 }
 0x4bf   : > { %v1721_v19 = vpop.permute.xlu0 %1720 }
 0x4c0   : > { %v4528_v58 = vadd.f32 %v1721_v19, %v4368_v54  ;;  %1806 = vrot.lane.b32.xlu1 %v4525_v17, %s3039_s4 }
 0x4c1   : > { %v1723_v49 = vpop.permute.xlu1 %1722 }
 0x4c2   : > { %v4533_v32 = vadd.f32 %v1723_v49, %v4373_v15  ;;  %1816 = vrot.lane.b32.xlu0 %v4528_v58, %s3039_s4 }
 0x4c3   : > { %v1717_v39 = vpop.permute.xlu0 %1716 }
 0x4c4   : > { %v4538_v57 = vadd.f32 %v1717_v39, %v4378_v37  ;;  %1818 = vrot.lane.b32.xlu1 %v4533_v32, %s3039_s4 }
 0x4c5   : > { %v1719_v22 = vpop.permute.xlu1 %1718 }
 0x4c6   : > { %v4543_v54 = vadd.f32 %v1719_v22, %v4383_v26  ;;  %1812 = vrot.lane.b32.xlu0 %v4538_v57, %s3039_s4 }
 0x4c7   : > { %v1729_v36 = vpop.permute.xlu0 %1728 }
 0x4c8   : > { %v4548_v15 = vadd.f32 %v1729_v36, %v4388_v34  ;;  %1814 = vrot.lane.b32.xlu1 %v4543_v54, %s3039_s4 }
 0x4c9   : > { %v1731_v19 = vpop.permute.xlu1 %1730 }
 0x4ca   : > { %v4553_v37 = vadd.f32 %v1731_v19, %v4393_v61  ;;  %1824 = vrot.lane.b32.xlu0 %v4548_v15, %s3039_s4 }
 0x4cb   : > { %v1725_v49 = vpop.permute.xlu0 %1724 }
 0x4cc   : > { %v4558_v26 = vadd.f32 %v1725_v49, %v4398_v62  ;;  %1826 = vrot.lane.b32.xlu1 %v4553_v37, %s3039_s4 }
 0x4cd   : > { %v1727_v39 = vpop.permute.xlu1 %1726 }
 0x4ce   : > { %v4563_v34 = vadd.f32 %v1727_v39, %v4403_v44  ;;  %1820 = vrot.lane.b32.xlu0 %v4558_v26, %s3039_s4 }
 0x4cf   : > { %v1737_v22 = vpop.permute.xlu0 %1736 }
 0x4d0   : > { %v4568_v61 = vadd.f32 %v1737_v22, %v4408_v51  ;;  %1822 = vrot.lane.b32.xlu1 %v4563_v34, %s3039_s4 }
 0x4d1   : > { %v1739_v36 = vpop.permute.xlu1 %1738 }
 0x4d2   : > { %v4573_v62 = vadd.f32 %v1739_v36, %v4413_v18  ;;  %1832 = vrot.lane.b32.xlu0 %v4568_v61, %s3039_s4 }
 0x4d3   : > { %v1733_v19 = vpop.permute.xlu0 %1732 }
 0x4d4   : > { %v4578_v44 = vadd.f32 %v1733_v19, %v4418_v35  ;;  %1834 = vrot.lane.b32.xlu1 %v4573_v62, %s3039_s4 }
 0x4d5   : > { %v1735_v49 = vpop.permute.xlu1 %1734 }
 0x4d6   : > { %v4583_v51 = vadd.f32 %v1735_v49, %v4423_v48  ;;  %1828 = vrot.lane.b32.xlu0 %v4578_v44, %s3039_s4 }
 0x4d7   : > { %v1745_v39 = vpop.permute.xlu0 %1744 }
 0x4d8   : > { %v4588_v18 = vadd.f32 %v1745_v39, %v4428_v63  ;;  %1830 = vrot.lane.b32.xlu1 %v4583_v51, %s3039_s4 }
 0x4d9   : > { %v1747_v22 = vpop.permute.xlu1 %1746 }
 0x4da   : > { %v4593_v35 = vadd.f32 %v1747_v22, %v4433_v42  ;;  %1840 = vrot.lane.b32.xlu0 %v4588_v18, %s3039_s4 }
 0x4db   : > { %v1741_v36 = vpop.permute.xlu0 %1740 }
 0x4dc   : > { %v4598_v48 = vadd.f32 %v1741_v36, %v4438_v28  ;;  %1842 = vrot.lane.b32.xlu1 %v4593_v35, %s3039_s4 }
 0x4dd   : > { %v1743_v19 = vpop.permute.xlu1 %1742 }
 0x4de   : > { %v4603_v63 = vadd.f32 %v1743_v19, %v4443_v45  ;;  %1836 = vrot.lane.b32.xlu0 %v4598_v48, %s3039_s4 }
 0x4df   : > { %v1753_v49 = vpop.permute.xlu0 %1752 }
 0x4e0   : > { %v4608_v42 = vadd.f32 %v1753_v49, %v4448_v4  ;;  %1838 = vrot.lane.b32.xlu1 %v4603_v63, %s3039_s4 }
 0x4e1   : > { %v1755_v39 = vpop.permute.xlu1 %1754 }
 0x4e2   : > { %v4613_v28 = vadd.f32 %v1755_v39, %v4453_v30  ;;  %1848 = vrot.lane.b32.xlu0 %v4608_v42, %s3039_s4 }
 0x4e3   : > { %v1749_v22 = vpop.permute.xlu0 %1748 }
 0x4e4   : > { %v4618_v45 = vadd.f32 %v1749_v22, %v4458_v38  ;;  %1850 = vrot.lane.b32.xlu1 %v4613_v28, %s3039_s4 }
 0x4e5   : > { %v1751_v36 = vpop.permute.xlu1 %1750 }
 0x4e6   : > { %v4623_v4 = vadd.f32 %v1751_v36, %v4463_v46  ;;  %1844 = vrot.lane.b32.xlu0 %v4618_v45, %s3039_s4 }
 0x4e7   : > { %v1761_v19 = vpop.permute.xlu0 %1760 }
 0x4e8   : > { %v4628_v30 = vadd.f32 %v1761_v19, %v4468_v53  ;;  %1846 = vrot.lane.b32.xlu1 %v4623_v4, %s3039_s4 }
 0x4e9   : > { %v1763_v49 = vpop.permute.xlu1 %1762 }
 0x4ea   : > { %v4633_v38 = vadd.f32 %v1763_v49, %v4473_v40  ;;  %1856 = vrot.lane.b32.xlu0 %v4628_v30, %s3039_s4 }
 0x4eb   : > { %v1757_v39 = vpop.permute.xlu0 %1756 }
 0x4ec   : > { %v4638_v46 = vadd.f32 %v1757_v39, %v4478_v7  ;;  %1858 = vrot.lane.b32.xlu1 %v4633_v38, %s3039_s4 }
 0x4ed   : > { %v1759_v22 = vpop.permute.xlu1 %1758 }
 0x4ee   : > { %v4643_v53 = vadd.f32 %v1759_v22, %v4483_v24  ;;  %1852 = vrot.lane.b32.xlu0 %v4638_v46, %s3039_s4 }
 0x4ef   : > { %v1769_v36 = vpop.permute.xlu0 %1768 }
 0x4f0   : > { %v4648_v40 = vadd.f32 %v1769_v36, %v4488_v23  ;;  %1854 = vrot.lane.b32.xlu1 %v4643_v53, %s3039_s4 }
 0x4f1   : > { %v1771_v19 = vpop.permute.xlu1 %1770 }
 0x4f2   : > { %v4653_v7 = vadd.f32 %v1771_v19, %v4493_v1  ;;  %1864 = vrot.lane.b32.xlu0 %v4648_v40, %s3039_s4 }
 0x4f3   : > { %v1765_v49 = vpop.permute.xlu0 %1764 }
 0x4f4   : > { %v4658_v24 = vadd.f32 %v1765_v49, %v4498_v13  ;;  %1866 = vrot.lane.b32.xlu1 %v4653_v7, %s3039_s4 }
 0x4f5   : > { %v1767_v39 = vpop.permute.xlu1 %1766 }
 0x4f6   : > { %v4663_v23 = vadd.f32 %v1767_v39, %v4503_v27  ;;  %1860 = vrot.lane.b32.xlu0 %v4658_v24, %s3039_s4 }
 0x4f8   : > { %1862 = vrot.lane.b32.xlu1 %v4663_v23, %s3039_s4 }
 0x52a   : > { %v1809_v1 = vpop.permute.xlu0 %1808 }
 0x52b   : > { %v4670_v22 = vadd.f32 %v1809_v1, %v4510_v0 }
 0x52d   : > { %1904 = vrot.lane.b32.xlu0 %v4670_v22, %s3040_s5 }
 0x52e   : > { %v1811_v13 = vpop.permute.xlu1 %1810 }
 0x52f   : > { %v4675_v36 = vadd.f32 %v1811_v13, %v4515_v47  ;;  %v1805_v19 = vpop.permute.xlu0 %1804 }
 0x530   : > { %v4678_v27 = vadd.f32 %v1805_v19, %v4518_v60 }
 0x531   : > { %1906 = vrot.lane.b32.xlu1 %v4675_v36, %s3040_s5 }
 0x532   : > { %1900 = vrot.lane.b32.xlu0 %v4678_v27, %s3040_s5  ;;  %v1807_v49 = vpop.permute.xlu1 %1806 }
 0x533   : > { %v4685_v0 = vadd.f32 %v1807_v49, %v4525_v17 }
 0x534   : > { %v1817_v39 = vpop.permute.xlu0 %1816 }
 0x535   : > { %v4688_v1 = vadd.f32 %v1817_v39, %v4528_v58  ;;  %1902 = vrot.lane.b32.xlu1 %v4685_v0, %s3040_s5 }
 0x536   : > { %v1819_v47 = vpop.permute.xlu1 %1818 }
 0x537   : > { %v4693_v60 = vadd.f32 %v1819_v47, %v4533_v32  ;;  %1912 = vrot.lane.b32.xlu0 %v4688_v1, %s3040_s5 }
 0x538   : > { %v1813_v13 = vpop.permute.xlu0 %1812 }
 0x539   : > { %v4698_v19 = vadd.f32 %v1813_v13, %v4538_v57  ;;  %1914 = vrot.lane.b32.xlu1 %v4693_v60, %s3040_s5 }
 0x53a   : > { %v1815_v17 = vpop.permute.xlu1 %1814 }
 0x53b   : > { %v4703_v58 = vadd.f32 %v1815_v17, %v4543_v54  ;;  %1908 = vrot.lane.b32.xlu0 %v4698_v19, %s3040_s5 }
 0x53c   : > { %v1825_v49 = vpop.permute.xlu0 %1824 }
 0x53d   : > { %v4708_v32 = vadd.f32 %v1825_v49, %v4548_v15  ;;  %1910 = vrot.lane.b32.xlu1 %v4703_v58, %s3040_s5 }
 0x53e   : > { %v1827_v39 = vpop.permute.xlu1 %1826 }
 0x53f   : > { %v4713_v57 = vadd.f32 %v1827_v39, %v4553_v37  ;;  %1920 = vrot.lane.b32.xlu0 %v4708_v32, %s3040_s5 }
 0x540   : > { %v1821_v47 = vpop.permute.xlu0 %1820 }
 0x541   : > { %v4718_v54 = vadd.f32 %v1821_v47, %v4558_v26  ;;  %1922 = vrot.lane.b32.xlu1 %v4713_v57, %s3040_s5 }
 0x542   : > { %v1823_v13 = vpop.permute.xlu1 %1822 }
 0x543   : > { %v4723_v15 = vadd.f32 %v1823_v13, %v4563_v34  ;;  %1916 = vrot.lane.b32.xlu0 %v4718_v54, %s3040_s5 }
 0x544   : > { %v1833_v17 = vpop.permute.xlu0 %1832 }
 0x545   : > { %v4728_v37 = vadd.f32 %v1833_v17, %v4568_v61  ;;  %1918 = vrot.lane.b32.xlu1 %v4723_v15, %s3040_s5 }
 0x546   : > { %v1835_v49 = vpop.permute.xlu1 %1834 }
 0x547   : > { %v4733_v26 = vadd.f32 %v1835_v49, %v4573_v62  ;;  %1928 = vrot.lane.b32.xlu0 %v4728_v37, %s3040_s5 }
 0x548   : > { %v1829_v39 = vpop.permute.xlu0 %1828 }
 0x549   : > { %v4738_v34 = vadd.f32 %v1829_v39, %v4578_v44  ;;  %1930 = vrot.lane.b32.xlu1 %v4733_v26, %s3040_s5 }
 0x54a   : > { %v1831_v47 = vpop.permute.xlu1 %1830 }
 0x54b   : > { %v4743_v61 = vadd.f32 %v1831_v47, %v4583_v51  ;;  %1924 = vrot.lane.b32.xlu0 %v4738_v34, %s3040_s5 }
 0x54c   : > { %v1841_v13 = vpop.permute.xlu0 %1840 }
 0x54d   : > { %v4748_v62 = vadd.f32 %v1841_v13, %v4588_v18  ;;  %1926 = vrot.lane.b32.xlu1 %v4743_v61, %s3040_s5 }
 0x54e   : > { %v1843_v17 = vpop.permute.xlu1 %1842 }
 0x54f   : > { %v4753_v44 = vadd.f32 %v1843_v17, %v4593_v35  ;;  %1936 = vrot.lane.b32.xlu0 %v4748_v62, %s3040_s5 }
 0x550   : > { %v1837_v49 = vpop.permute.xlu0 %1836 }
 0x551   : > { %v4758_v51 = vadd.f32 %v1837_v49, %v4598_v48  ;;  %1938 = vrot.lane.b32.xlu1 %v4753_v44, %s3040_s5 }
 0x552   : > { %v1839_v39 = vpop.permute.xlu1 %1838 }
 0x553   : > { %v4763_v18 = vadd.f32 %v1839_v39, %v4603_v63  ;;  %1932 = vrot.lane.b32.xlu0 %v4758_v51, %s3040_s5 }
 0x554   : > { %v1849_v47 = vpop.permute.xlu0 %1848 }
 0x555   : > { %v4768_v35 = vadd.f32 %v1849_v47, %v4608_v42  ;;  %1934 = vrot.lane.b32.xlu1 %v4763_v18, %s3040_s5 }
 0x556   : > { %v1851_v13 = vpop.permute.xlu1 %1850 }
 0x557   : > { %v4773_v48 = vadd.f32 %v1851_v13, %v4613_v28  ;;  %1944 = vrot.lane.b32.xlu0 %v4768_v35, %s3040_s5 }
 0x558   : > { %v1845_v17 = vpop.permute.xlu0 %1844 }
 0x559   : > { %v4778_v63 = vadd.f32 %v1845_v17, %v4618_v45  ;;  %1946 = vrot.lane.b32.xlu1 %v4773_v48, %s3040_s5 }
 0x55a   : > { %v1847_v49 = vpop.permute.xlu1 %1846 }
 0x55b   : > { %v4783_v42 = vadd.f32 %v1847_v49, %v4623_v4  ;;  %1940 = vrot.lane.b32.xlu0 %v4778_v63, %s3040_s5 }
 0x55c   : > { %v1857_v39 = vpop.permute.xlu0 %1856 }
 0x55d   : > { %v4788_v28 = vadd.f32 %v1857_v39, %v4628_v30  ;;  %1942 = vrot.lane.b32.xlu1 %v4783_v42, %s3040_s5 }
 0x55e   : > { %v1859_v47 = vpop.permute.xlu1 %1858 }
 0x55f   : > { %v4793_v45 = vadd.f32 %v1859_v47, %v4633_v38  ;;  %1952 = vrot.lane.b32.xlu0 %v4788_v28, %s3040_s5 }
 0x560   : > { %v1853_v13 = vpop.permute.xlu0 %1852 }
 0x561   : > { %v4798_v4 = vadd.f32 %v1853_v13, %v4638_v46  ;;  %1954 = vrot.lane.b32.xlu1 %v4793_v45, %s3040_s5 }
 0x562   : > { %v1855_v17 = vpop.permute.xlu1 %1854 }
 0x563   : > { %v4803_v30 = vadd.f32 %v1855_v17, %v4643_v53  ;;  %1948 = vrot.lane.b32.xlu0 %v4798_v4, %s3040_s5 }
 0x564   : > { %v1865_v49 = vpop.permute.xlu0 %1864 }
 0x565   : > { %1950 = vrot.lane.b32.xlu1 %v4803_v30, %s3040_s5  ;;  %v4818_v53 = vadd.f32 %v1865_v49, %v4648_v40 }
 0x566   : > { %v1867_v38 = vpop.permute.xlu1 %1866 }
 0x567   : > { %5075 = vst [vmem:[#allocation16_spill] sm:$0xff] %v4818_v53  ;;  %v4823_v17 = vadd.f32 %v1867_v38, %v4653_v7 }
 0x568   : > { %v1861_v39 = vpop.permute.xlu0 %1860 }
 0x569   : > { %v4810_v47 = vadd.f32 %v1861_v39, %v4658_v24  ;;  %5076 = vst [vmem:[#allocation17_spill] sm:$0xff] %v4823_v17 }
 0x56a   : > { %v1863_v46 = vpop.permute.xlu1 %1862 }
 0x56b   : > { %v4813_v13 = vadd.f32 %v1863_v46, %v4663_v23  ;;  %1956 = vrot.lane.b32.xlu0 %v4810_v47, %s3040_s5 }
 0x56d   : > { %5074 = vst [vmem:[#allocation9_spill] sm:$0xff] %v4813_v13  ;;  %1958 = vrot.lane.b32.xlu1 %v4813_v13, %s3040_s5 }
 0x56f   : > { %1960 = vrot.lane.b32.xlu0 %v4818_v53, %s3040_s5 }
 0x571   : > { %1962 = vrot.lane.b32.xlu1 %v4823_v17, %s3040_s5 }
 0x59f   : > { %v1905_v24 = vpop.permute.xlu0 %1904 }
 0x5a0   : > { %v1966_v23 = vadd.f32 %v1905_v24, %v4670_v22 }
 0x5a2   : > { %2947 = vrcp.f32 %v1966_v23 }
 0x5a3   : > { %v1907_v39 = vpop.permute.xlu1 %1906 }
 0x5a4   : > { %v1967_v40 = vadd.f32 %v1907_v39, %v4675_v36  ;;  %v1901_v49 = vpop.permute.xlu0 %1900 }
 0x5a5   : > { %v1964_v46 = vadd.f32 %v1901_v49, %v4678_v27 }
 0x5a6   : > { %2949 = vrcp.f32 %v1967_v40 }
 0x5a7   : > { %2951 = vrcp.f32 %v1964_v46  ;;  %v1903_v7 = vpop.permute.xlu1 %1902 }
 0x5a8   : > { %v1965_v38 = vadd.f32 %v1903_v7, %v4685_v0 }
 0x5a9   : > { %v1913_v9 = vpop.permute.xlu0 %1912 }
 0x5aa   : > { %2953 = vrcp.f32 %v1965_v38  ;;  %v1970_v52 = vadd.f32 %v1913_v9, %v4688_v1 }
 0x5ab   : > { %v1915_v17 = vpop.permute.xlu1 %1914 }
 0x5ac   : > { %2955 = vrcp.f32 %v1970_v52  ;;  %v1971_v22 = vadd.f32 %v1915_v17, %v4693_v60 }
 0x5ad   : > { %v1909_v24 = vpop.permute.xlu0 %1908 }
 0x5ae   : > { %2957 = vrcp.f32 %v1971_v22  ;;  %v1968_v36 = vadd.f32 %v1909_v24, %v4698_v19 }
 0x5af   : > { %v2948_v39 = vpop.eup %2947  ;;  %v1911_v2 = vpop.permute.xlu1 %1910 }
 0x5b0   : > { %v2030_v27 = vmul.f32 %v2948_v39, %v1966_v23  ;;  %2959 = vrcp.f32 %v1968_v36  ;;  %v1969_v49 = vadd.f32 %v1911_v2, %v4703_v58 }
 0x5b1   : > { %v1921_v25 = vpop.permute.xlu0 %1920 }
 0x5b2   : > { %v2062_v0 = vsub.f32 2.0, %v2030_v27  ;;  %2961 = vrcp.f32 %v1969_v49  ;;  %v1974_v7 = vadd.f32 %v1921_v25, %v4708_v32 }
 0x5b3   : > { %v2950_v9 = vpop.eup %2949  ;;  %v1923_v1 = vpop.permute.xlu1 %1922 }
 0x5b4   : > { %v2952_v53 = vpop.eup %2951  ;;  %v2031_v60 = vmul.f32 %v2950_v9, %v1967_v40  ;;  %2963 = vrcp.f32 %v1974_v7  ;;  %v4839_v17 = vadd.f32 %v1923_v1, %v4713_v57  ;;  %v2094_v19 = vmul.f32 %v2948_v39, %v2062_v0 }
 0x5b5   : > { %v2028_v24 = vmul.f32 %v2952_v53, %v1964_v46  ;;  %v1917_v23 = vpop.permute.xlu0 %1916 }
 0x5b6   : > { %v2063_v13 = vsub.f32 2.0, %v2031_v60  ;;  %2965 = vrcp.f32 %v4839_v17  ;;  %v4843_v2 = vadd.f32 %v1917_v23, %v4718_v54  ;;  %v2126_v46 = vmul.f32 %v4014_v50, %v2094_v19 }
 0x5b7   : > { %v2954_v58 = vpop.eup %2953  ;;  %v2060_v25 = vsub.f32 2.0, %v2028_v24  ;;  %v1919_v32 = vpop.permute.xlu1 %1918 }
 0x5b8   : > { %v2095_v27 = vmul.f32 %v2950_v9, %v2063_v13  ;;  %v2029_v29 = vmul.f32 %v2954_v58, %v1965_v38  ;;  %2967 = vrcp.f32 %v4843_v2  ;;  %v4848_v57 = vadd.f32 %v1919_v32, %v4723_v15 }
 0x5b9   : > { %v2956_v40 = vpop.eup %2955  ;;  %v2092_v39 = vmul.f32 %v2952_v53, %v2060_v25  ;;  %v1929_v0 = vpop.permute.xlu0 %1928 }
 0x5ba   : > { %v2127_v1 = vmul.f32 %v4022_v31, %v2095_v27  ;;  %v2061_v54 = vsub.f32 2.0, %v2029_v29  ;;  %v2034_v60 = vmul.f32 %v2956_v40, %v1970_v52  ;;  %2969 = vrcp.f32 %v4848_v57 }
 0x5bb   : > { %v2958_v24 = vpop.eup %2957  ;;  %v4859_v15 = vadd.f32 %v1929_v0, %v4728_v37  ;;  %v1931_v13 = vpop.permute.xlu1 %1930  ;;  %v2124_v29 = vmul.f32 %v4024_v55, %v2092_v39 }
 0x5bc   : > { %v2575_v50 = vpack.c.bf16 %v2127_v1, %v2126_v46  ;;  %v2093_v53 = vmul.f32 %v2954_v58, %v2061_v54  ;;  %v2066_v38 = vsub.f32 2.0, %v2034_v60  ;;  %v2035_v9 = vmul.f32 %v2958_v24, %v1971_v22 }
 0x5bd   : > { %v2960_v31 = vpop.eup %2959  ;;  %2971 = vrcp.f32 %v4859_v15  ;;  %v4864_v52 = vadd.f32 %v1931_v13, %v4733_v26  ;;  %v1925_v19 = vpop.permute.xlu0 %1924 }
 0x5be   : > { %2647 = vst [vmem:[%s4856_s9 + $0x8] sm:$0xff] %v2575_v50   ;;  %v2125_v23 = vmul.f32 %v4034_v5, %v2093_v53  ;;  %v2098_v37 = vmul.f32 %v2956_v40, %v2066_v38  ;;  %v2067_v25 = vsub.f32 2.0, %v2035_v9  ;;  %v2032_v32 = vmul.f32 %v2960_v31, %v1968_v36 }
 0x5bf   : > { %v2962_v27 = vpop.eup %2961  ;;  %2973 = vrcp.f32 %v4864_v52  ;;  %v4870_v22 = vadd.f32 %v1925_v19, %v4738_v34  ;;  %v1927_v55 = vpop.permute.xlu1 %1926 }
 0x5c0   : > { %v2570_v58 = vpack.c.bf16 %v2125_v23, %v2124_v29  ;;  %v2099_v46 = vmul.f32 %v2958_v24, %v2067_v25  ;;  %v2064_v39 = vsub.f32 2.0, %v2032_v32  ;;  %v2033_v0 = vmul.f32 %v2962_v27, %v1969_v49 }
 0x5c1   : > { %v2964_v26 = vpop.eup %2963  ;;  %2975 = vrcp.f32 %v4870_v22  ;;  %v4874_v5 = vadd.f32 %v1927_v55, %v4743_v61  ;;  %v1937_v40 = vpop.permute.xlu0 %1936  ;;  %v2130_v36 = vmul.f32 %v4040_v11, %v2098_v37 }
 0x5c2   : > { %2571 = vst [vmem:[%s4856_s9] sm:$0xff] %v2570_v58   ;;  %v2131_v1 = vmul.f32 %v4046_v16, %v2099_v46  ;;  %v2038_v34 = vmul.f32 %v2964_v26, %v1974_v7  ;;  %v4880_v54 = vadd.f32 %v1937_v40, %v4748_v62  ;;  %v2096_v24 = vmul.f32 %v2960_v31, %v2064_v39 }
 0x5c3   : > { %v2966_v60 = vpop.eup %2965  ;;  %v2065_v13 = vsub.f32 2.0, %v2033_v0  ;;  %2977 = vrcp.f32 %v4874_v5  ;;  %v1939_v49 = vpop.permute.xlu1 %1938 }
 0x5c4   : > { %v2585_v50 = vpack.c.bf16 %v2131_v1, %v2130_v36  ;;  %v2070_v61 = vsub.f32 2.0, %v2038_v34  ;;  %v2039_v53 = vmul.f32 %v2966_v60, %v4839_v17  ;;  %2979 = vrcp.f32 %v4880_v54 }
 0x5c5   : > { %v2968_v38 = vpop.eup %2967  ;;  %v2097_v9 = vmul.f32 %v2962_v27, %v2065_v13  ;;  %v4886_v11 = vadd.f32 %v1939_v49, %v4753_v44  ;;  %v1933_v16 = vpop.permute.xlu0 %1932  ;;  %v2128_v23 = vmul.f32 %v4052_v41, %v2096_v24 }
 0x5c6   : > { %2649 = vst [vmem:[%s4856_s9 + $0x18] sm:$0xff] %v2585_v50   ;;  %v2102_v62 = vmul.f32 %v2964_v26, %v2070_v61  ;;  %v2071_v7 = vsub.f32 2.0, %v2039_v53  ;;  %v2036_v31 = vmul.f32 %v2968_v38, %v4843_v2  ;;  %v4891_v29 = vadd.f32 %v1933_v16, %v4758_v51 }
 0x5c7   : > { %v2970_v19 = vpop.eup %2969  ;;  %v2129_v17 = vmul.f32 %v4058_v8, %v2097_v9  ;;  %2981 = vrcp.f32 %v4886_v11  ;;  %v1935_v37 = vpop.permute.xlu1 %1934 }
 0x5c8   : > { %v2103_v44 = vmul.f32 %v2966_v60, %v2071_v7  ;;  %v2068_v25 = vsub.f32 2.0, %v2036_v31  ;;  %v2037_v32 = vmul.f32 %v2970_v19, %v4848_v57  ;;  %v2134_v55 = vmul.f32 %v4064_v59, %v2102_v62 }
 0x5c9   : > { %v2580_v27 = vpack.c.bf16 %v2129_v17, %v2128_v23  ;;  %2983 = vrcp.f32 %v4891_v29  ;;  %v4900_v51 = vadd.f32 %v1935_v37, %v4763_v18  ;;  %v1945_v2 = vpop.permute.xlu0 %1944 }
 0x5ca   : > { %v2972_v41 = vpop.eup %2971  ;;  %v2135_v8 = vmul.f32 %v4070_v33, %v2103_v44  ;;  %v2100_v58 = vmul.f32 %v2968_v38, %v2068_v25  ;;  %v2069_v46 = vsub.f32 2.0, %v2037_v32  ;;  %v4904_v39 = vadd.f32 %v1945_v2, %v4768_v35 }
 0x5cb   : > { %2648 = vst [vmem:[%s4856_s9 + $0x10] sm:$0xff] %v2580_v27   ;;  %v2042_v57 = vmul.f32 %v2972_v41, %v4859_v15  ;;  %2985 = vrcp.f32 %v4900_v51  ;;  %v1947_v59 = vpop.permute.xlu1 %1946 }
 0x5cc   : > { %v2974_v26 = vpop.eup %2973  ;;  %v2595_v0 = vpack.c.bf16 %v2135_v8, %v2134_v55  ;;  %v2101_v18 = vmul.f32 %v2970_v19, %v2069_v46  ;;  %2987 = vrcp.f32 %v4904_v39  ;;  %v4912_v36 = vadd.f32 %v1947_v59, %v4773_v48 }
 0x5cd   : > { %v2074_v40 = vsub.f32 2.0, %v2042_v57  ;;  %v2043_v33 = vmul.f32 %v2974_v26, %v4864_v52  ;;  %v1941_v1 = vpop.permute.xlu0 %1940  ;;  %v2132_v34 = vmul.f32 %v4076_v20, %v2100_v58 }
 0x5ce   : > { %v2976_v35 = vpop.eup %2975  ;;  %2651 = vst [vmem:[%s4856_s9 + $0x28] sm:$0xff] %v2595_v0   ;;  %v2133_v15 = vmul.f32 %v4082_v14, %v2101_v18  ;;  %v4918_v60 = vadd.f32 %v1941_v1, %v4778_v63  ;;  %2989 = vrcp.f32 %v4912_v36 }
 0x5cf   : > { %v2106_v24 = vmul.f32 %v2972_v41, %v2074_v40  ;;  %v2075_v13 = vsub.f32 2.0, %v2043_v33  ;;  %v2040_v49 = vmul.f32 %v2976_v35, %v4870_v22  ;;  %v1943_v52 = vpop.permute.xlu1 %1942 }
 0x5d0   : > { %v2978_v48 = vpop.eup %2977  ;;  %v2590_v50 = vpack.c.bf16 %v2133_v15, %v2132_v34  ;;  %2991 = vrcp.f32 %v4918_v60  ;;  %v4924_v61 = vadd.f32 %v1943_v52, %v4783_v42  ;;  %v5077_v15 = vld [vmem:[#allocation2_spill] sm:$0xff] }
 0x5d1   : > { %v2107_v20 = vmul.f32 %v2974_v26, %v2075_v13  ;;  %v2072_v14 = vsub.f32 2.0, %v2040_v49  ;;  %v2041_v53 = vmul.f32 %v2978_v48, %v4874_v5  ;;  %v1953_v63 = vpop.permute.xlu0 %1952  ;;  %v2980_v38 = vpop.eup %2979  ;;  %v2138_v9 = vmul.f32 %v4088_v10, %v2106_v24 }
 0x5d2   : > { %2650 = vst [vmem:[%s4856_s9 + $0x20] sm:$0xff] %v2590_v50   ;;  %2993 = vrcp.f32 %v4924_v61  ;;  %v4931_v22 = vadd.f32 %v1953_v63, %v4788_v28  ;;  %v2046_v7 = vmul.f32 %v2980_v38, %v4880_v54  ;;  %v5079_v63 = vld [vmem:[#allocation16_spill] sm:$0xff] }
 0x5d3   : > { %v2139_v16 = vmul.f32 %v4094_v3, %v2107_v20  ;;  %v2104_v62 = vmul.f32 %v2976_v35, %v2072_v14  ;;  %v2073_v42 = vsub.f32 2.0, %v2041_v53  ;;  %v1955_v31 = vpop.permute.xlu1 %1954 }
 0x5d4   : > { %v2982_v19 = vpop.eup %2981  ;;  %2995 = vrcp.f32 %v4931_v22  ;;  %v4937_v5 = vadd.f32 %v1955_v31, %v4793_v45  ;;  %v2078_v17 = vsub.f32 2.0, %v2046_v7 }
 0x5d5   : > { %v2605_v10 = vpack.c.bf16 %v2139_v16, %v2138_v9  ;;  %v2105_v23 = vmul.f32 %v2978_v48, %v2073_v42  ;;  %v1949_v37 = vpop.permute.xlu0 %1948  ;;  %v2047_v44 = vmul.f32 %v2982_v19, %v4886_v11  ;;  %v2136_v54 = vmul.f32 %v4100_v6, %v2104_v62  ;;  %v5080_v16 = vld [vmem:[#allocation3_spill] sm:$0xff]  ;;  %v5081_v42 = vld [vmem:[#allocation10_spill] sm:$0xff] }
 0x5d6   : > { %v2984_v28 = vpop.eup %2983  ;;  %2997 = vrcp.f32 %v4937_v5  ;;  %v4942_v3 = vadd.f32 %v1949_v37, %v4798_v4  ;;  %v2110_v55 = vmul.f32 %v2980_v38, %v2078_v17  ;;  %v5082_v37 = vld [vmem:[#allocation4_spill] sm:$0xff] }
 0x5d7   : > { %2653 = vst [vmem:[%s4856_s9 + $0x38] sm:$0xff] %v2605_v10   ;;  %v2137_v25 = vmul.f32 %v4106_v56, %v2105_v23  ;;  %v2044_v45 = vmul.f32 %v2984_v28, %v4891_v29  ;;  %v1951_v32 = vpop.permute.xlu1 %1950  ;;  %v2079_v2 = vsub.f32 2.0, %v2047_v44 }
 0x5d8   : > { %v2986_v27 = vpop.eup %2985  ;;  %2999 = vrcp.f32 %v4942_v3  ;;  %v4950_v11 = vadd.f32 %v1951_v32, %v4803_v30  ;;  %v2142_v59 = vmul.f32 %v4112_v12, %v2110_v55 }
 0x5d9   : > { %v2988_v41 = vpop.eup %2987  ;;  %v2600_v4 = vpack.c.bf16 %v2137_v25, %v2136_v54  ;;  %v2076_v8 = vsub.f32 2.0, %v2044_v45  ;;  %v2045_v58 = vmul.f32 %v2986_v27, %v4900_v51  ;;  %v2111_v6 = vmul.f32 %v2982_v19, %v2079_v2  ;;  %v5084_v54 = vld [vmem:[#allocation11_spill] sm:$0xff] }
 0x5da   : > { %v2050_v46 = vmul.f32 %v2988_v41, %v4904_v39  ;;  %3001 = vrcp.f32 %v4950_v11 }
 0x5db   : > { %2652 = vst [vmem:[%s4856_s9 + $0x30] sm:$0xff] %v2600_v4   ;;  %v2108_v56 = vmul.f32 %v2984_v28, %v2076_v8  ;;  %v2077_v29 = vsub.f32 2.0, %v2045_v58  ;;  %v2990_v57 = vpop.eup %2989  ;;  %v2143_v30 = vmul.f32 %v4118_v43, %v2111_v6  ;;  %v5083_v28 = vld [vmem:[#allocation17_spill] sm:$0xff]  ;;  %v5086_v6 = vld [vmem:[#allocation12_spill] sm:$0xff] }
 0x5dc   : > { %v2082_v26 = vsub.f32 2.0, %v2050_v46  ;;  %v2051_v40 = vmul.f32 %v2990_v57, %v4912_v36  ;;  %v5085_v8 = vld [vmem:[#allocation5_spill] sm:$0xff] }
 0x5dd   : > { %v2992_v0 = vpop.eup %2991  ;;  %v2109_v18 = vmul.f32 %v2986_v27, %v2077_v29  ;;  %v1957_v51 = vpop.permute.xlu0 %1956  ;;  %v2615_v33 = vpack.c.bf16 %v2143_v30, %v2142_v59  ;;  %v2140_v34 = vmul.f32 %v4124_v21, %v2108_v56 }
 0x5de   : > { %v2048_v39 = vmul.f32 %v2992_v0, %v4918_v60  ;;  %v1992_v1 = vadd.f32 %v1957_v51, %v4810_v47  ;;  %v2114_v12 = vmul.f32 %v2988_v41, %v2082_v26  ;;  %v2083_v13 = vsub.f32 2.0, %v2051_v40  ;;  %v5078_v60 = vld [vmem:[#allocation9_spill] sm:$0xff]  ;;  %v5087_v26 = vld [vmem:[#allocation6_spill] sm:$0xff] }
 0x5df   : > { %v2994_v35 = vpop.eup %2993  ;;  %v2141_v24 = vmul.f32 %v5077_v15, %v2109_v18  ;;  %v1959_v43 = vpop.permute.xlu1 %1958  ;;  %2655 = vst [vmem:[%s4856_s9 + $0x48] sm:$0xff] %v2615_v33   ;;  %v5088_v18 = vld [vmem:[#allocation13_spill] sm:$0xff] }
 0x5e0   : > { %v2080_v49 = vsub.f32 2.0, %v2048_v39  ;;  %v2049_v52 = vmul.f32 %v2994_v35, %v4924_v61  ;;  %3003 = vrcp.f32 %v1992_v1  ;;  %v2115_v50 = vmul.f32 %v2990_v57, %v2083_v13 }
 0x5e1   : > { %v2996_v36 = vpop.eup %2995  ;;  %v2610_v48 = vpack.c.bf16 %v2141_v24, %v2140_v34  ;;  %v1993_v20 = vadd.f32 %v1959_v43, %v5078_v60  ;;  %v1961_v47 = vpop.permute.xlu0 %1960  ;;  %v2146_v62 = vmul.f32 %v5080_v16, %v2114_v12 }
 0x5e2   : > { %v2112_v14 = vmul.f32 %v2992_v0, %v2080_v49  ;;  %v2081_v53 = vsub.f32 2.0, %v2049_v52  ;;  %v2054_v21 = vmul.f32 %v2996_v36, %v4931_v22  ;;  %v1994_v38 = vadd.f32 %v1961_v47, %v5079_v63 }
 0x5e3   : > { %v2998_v9 = vpop.eup %2997  ;;  %2654 = vst [vmem:[%s4856_s9 + $0x40] sm:$0xff] %v2610_v48   ;;  %v2147_v7 = vmul.f32 %v5081_v42, %v2115_v50  ;;  %3005 = vrcp.f32 %v1993_v20  ;;  %v1963_v61 = vpop.permute.xlu1 %1962 }
 0x5e4   : > { %v2113_v31 = vmul.f32 %v2994_v35, %v2081_v53  ;;  %v2086_v19 = vsub.f32 2.0, %v2054_v21  ;;  %v2055_v10 = vmul.f32 %v2998_v9, %v4937_v5  ;;  %v2144_v22 = vmul.f32 %v5082_v37, %v2112_v14  ;;  %v5092_v21 = vld [vmem:[#allocation14_spill] sm:$0xff] }
 0x5e5   : > { %v3000_v23 = vpop.eup %2999  ;;  %v2625_v17 = vpack.c.bf16 %v2147_v7, %v2146_v62  ;;  %3007 = vrcp.f32 %v1994_v38  ;;  %v1995_v44 = vadd.f32 %v1963_v61, %v5083_v28 }
 0x5e6   : > { %v2145_v25 = vmul.f32 %v5084_v54, %v2113_v31  ;;  %v2118_v45 = vmul.f32 %v2996_v36, %v2086_v19  ;;  %v2087_v32 = vsub.f32 2.0, %v2055_v10  ;;  %v2052_v27 = vmul.f32 %v3000_v23, %v4942_v3  ;;  %v5090_v36 = vld [vmem:[#allocation15_spill] sm:$0xff] }
 0x5e7   : > { %v3002_v55 = vpop.eup %3001  ;;  %2657 = vst [vmem:[%s4856_s9 + $0x58] sm:$0xff] %v2625_v17   ;;  %3009 = vrcp.f32 %v1995_v44 }
 0x5e8   : > { %v2620_v2 = vpack.c.bf16 %v2145_v25, %v2144_v22  ;;  %v2119_v5 = vmul.f32 %v2998_v9, %v2087_v32  ;;  %v2084_v41 = vsub.f32 2.0, %v2052_v27  ;;  %v2053_v4 = vmul.f32 %v3002_v55, %v4950_v11 }
 0x5e9   : > { %v2150_v58 = vmul.f32 %v5085_v8, %v2118_v45 }
 0x5ea   : > { %2656 = vst [vmem:[%s4856_s9 + $0x50] sm:$0xff] %v2620_v2   ;;  %v2151_v46 = vmul.f32 %v5086_v6, %v2119_v5  ;;  %v2116_v56 = vmul.f32 %v3000_v23, %v2084_v41  ;;  %v2085_v29 = vsub.f32 2.0, %v2053_v4 }
 0x5ec   : > { %v2635_v57 = vpack.c.bf16 %v2151_v46, %v2150_v58  ;;  %v2117_v3 = vmul.f32 %v3002_v55, %v2085_v29  ;;  %v2148_v0 = vmul.f32 %v5087_v26, %v2116_v56 }
 0x5ed   : > { %v3004_v59 = vpop.eup %3003 }
 0x5ee   : > { %2659 = vst [vmem:[%s4856_s9 + $0x68] sm:$0xff] %v2635_v57   ;;  %v2056_v30 = vmul.f32 %v3004_v59, %v1992_v1  ;;  %v2149_v40 = vmul.f32 %v5088_v18, %v2117_v3  ;;  %v5089_v1 = vld [vmem:[#allocation8_spill] sm:$0xff] }
 0x5f0   : > { %v3006_v51 = vpop.eup %3005  ;;  %v2088_v33 = vsub.f32 2.0, %v2056_v30  ;;  %v2630_v11 = vpack.c.bf16 %v2149_v40, %v2148_v0 }
 0x5f1   : > { %v2057_v39 = vmul.f32 %v3006_v51, %v1993_v20  ;;  %v5091_v20 = vld [vmem:[#allocation7_spill] sm:$0xff] }
 0x5f2   : > { %v3008_v35 = vpop.eup %3007  ;;  %2658 = vst [vmem:[%s4856_s9 + $0x60] sm:$0xff] %v2630_v11   ;;  %v2120_v34 = vmul.f32 %v3004_v59, %v2088_v33 }
 0x5f3   : > { %v2089_v15 = vsub.f32 2.0, %v2057_v39  ;;  %v2058_v24 = vmul.f32 %v3008_v35, %v1994_v38 }
 0x5f4   : > { %v3010_v12 = vpop.eup %3009  ;;  %v2152_v52 = vmul.f32 %v5089_v1, %v2120_v34 }
 0x5f5   : > { %v2121_v13 = vmul.f32 %v3006_v51, %v2089_v15  ;;  %v2090_v43 = vsub.f32 2.0, %v2058_v24  ;;  %v2059_v49 = vmul.f32 %v3010_v12, %v1995_v44 }
 0x5f7   : > { %v2153_v48 = vmul.f32 %v5090_v36, %v2121_v13  ;;  %v2122_v50 = vmul.f32 %v3008_v35, %v2090_v43  ;;  %v2091_v60 = vsub.f32 2.0, %v2059_v49 }
 0x5f9   : > { %v2640_v47 = vpack.c.bf16 %v2153_v48, %v2152_v52  ;;  %v2123_v14 = vmul.f32 %v3010_v12, %v2091_v60  ;;  %v2154_v53 = vmul.f32 %v5091_v20, %v2122_v50 }
 0x5fb   : > { %2660 = vst [vmem:[%s4856_s9 + $0x70] sm:$0xff] %v2640_v47   ;;  %v2155_v63 = vmul.f32 %v5092_v21, %v2123_v14 }
 0x5fd   : > { %v2645_v9 = vpack.c.bf16 %v2155_v63, %v2154_v53 }
 0x5ff   : > { %2661 = vst [vmem:[%s4856_s9 + $0x78] sm:$0xff] %v2645_v9  }
 0x600 PF: > { %s12_s11 = sadd.s32 1, %s3033_s11   ;;  %s5093_s9 = smov %s3029_s10 }
 0x601   : > { %p9_p5 = scmp.ge.s32.totalorder %s12_s11, 4   ;;  %s5094_s10 = smov %s5096_s12 }
 0x603   :  { %11 = sbr.rel (!%p9_p5) target bundleno = 2 (0x2), region = 60 }

</bundles_post_ra>
